<compile_context>
chip_gen: v6e
topology: v6e:2x2x1
jax: 0.10.0
libtpu: 0.0.40
codegen_flags: <defaults>
</compile_context>

<pallas_src>
import math

import jax
import jax.numpy as jnp
from jax.experimental import pallas as pl
from jax.experimental.pallas import tpu as pltpu

_EPS = 1e-5


# --------------------- wrapper-side parameter preprocessing ---------------------

def _fold_bn(gamma, beta, mean, var):
    s = gamma / jnp.sqrt(var + _EPS)
    return s, beta - mean * s


def _bands_stride1(w, width):
    """w: [3,3,Cin,Cout] -> [3, width*Cin, width*Cout] bf16 banded matrices.

    B_dy[xin*Cin+ci, ox*Cout+co] = w[dy, xin-ox+1, ci, co] inside the band, 0 outside,
    so a stride-1 / pad-1 conv on lane-packed rows is  out = sum_dy rowshift_dy(A) @ B_dy.
    Zero padding in x is encoded by the band; zero padding in y by the row shifts.
    """
    eye0 = jnp.eye(width, dtype=w.dtype)
    eyep = jnp.eye(width, k=1, dtype=w.dtype)    # xin == ox - 1  (kx = 0)
    eyem = jnp.eye(width, k=-1, dtype=w.dtype)   # xin == ox + 1  (kx = 2)
    bands = [jnp.kron(eyep, w[dy, 0]) + jnp.kron(eye0, w[dy, 1]) + jnp.kron(eyem, w[dy, 2])
             for dy in range(3)]
    return jnp.stack(bands).astype(jnp.bfloat16)


def _bands_stride2(w, wo):
    """w: [3,3,Cin,Cout] -> [6, wo*Cin, wo*Cout] bf16; index = 2*ky + column_parity.

    Used with the polyphase (even/odd rows x even/odd cols) decomposition of the input:
      column parity 0 (even cols) carries the kx=1 tap, parity 1 carries kx in {0,2}.
    """
    eye0 = jnp.eye(wo, dtype=w.dtype)
    eyep = jnp.eye(wo, k=1, dtype=w.dtype)
    bands = []
    for ky in range(3):
        bands.append(jnp.kron(eye0, w[ky, 1]))                             # even cols
        bands.append(jnp.kron(eyep, w[ky, 0]) + jnp.kron(eye0, w[ky, 2]))  # odd cols
    return jnp.stack(bands).astype(jnp.bfloat16)


def _band_1x1(wsc, width):
    """wsc: [Cin, Cout] -> block-diagonal [width*Cin, width*Cout] bf16 (1x1 conv)."""
    return jnp.kron(jnp.eye(width, dtype=wsc.dtype), wsc).astype(jnp.bfloat16)


def _const_spec(arr):
    """Full-array block, same block every grid step -> loaded once, VMEM-resident."""
    ndim = arr.ndim

    def idx(n):
        return (0,) * ndim

    return pl.BlockSpec(tuple(arr.shape), idx)


# ------------------------- fused NetworkBlock forward ----------------------------

def network_block_forward(x, params, in_planes, out_planes, stride):
    """x: [N, H, W, in_planes] NHWC f32.  Whole NetworkBlock in one pallas_call."""
    N, H, W, C0 = x.shape
    assert C0 == in_planes
    assert stride in (1, 2), "only stride 1 or 2 supported"
    if stride == 2:
        assert H % 2 == 0 and W % 2 == 0, "stride-2 path requires even H, W"
    Ho, Wo = H // stride, W // stride
    C1 = out_planes

    inputs, in_specs, layer_meta = [], [], []

    # network input, lane-packed (channels innermost on the lane dim)
    if stride == 2:
        phases = [x[:, py::2, px::2, :].reshape(N, Ho, Wo * C0)
                  for py in (0, 1) for px in (0, 1)]          # EE, EO, OE, OO
        inputs.append(jnp.stack(phases, axis=1))              # [N, 4, Ho, Wo*C0]
        in_specs.append(pl.BlockSpec((None, 4, Ho, Wo * C0), lambda n: (n, 0, 0, 0)))
    else:
        inputs.append(x.reshape(N, H, W * C0))                # [N, H, W*C0]
        in_specs.append(pl.BlockSpec((None, H, W * C0), lambda n: (n, 0, 0)))

    # zero-filled row-shift matrices (applied on the MXU): down[i] = a[i-1], up[i] = a[i+1]
    shifts = jnp.stack([jnp.eye(Ho, k=-1, dtype=jnp.float32),
                        jnp.eye(Ho, k=1, dtype=jnp.float32)])
    inputs.append(shifts)
    in_specs.append(_const_spec(shifts))

    for i, p in enumerate(params):
        cin = in_planes if i == 0 else out_planes
        s = stride if i == 0 else 1
        equal = (cin == out_planes)
        if s != 1:
            assert not equal, "stride != 1 with in_planes == out_planes is unsupported"
        w_in = (Wo if s == 2 else W) if i == 0 else Wo        # lane-pack width of layer input

        s1, b1 = _fold_bn(p["gamma1"], p["beta1"], p["mean1"], p["var1"])
        s2, b2 = _fold_bn(p["gamma2"], p["beta2"], p["mean2"], p["var2"])
        layer_inputs = [
            jnp.tile(s1, w_in).reshape(1, -1),
            jnp.tile(b1, w_in).reshape(1, -1),
            _bands_stride2(p["w1"], Wo) if s == 2 else _bands_stride1(p["w1"], w_in),
            jnp.tile(s2, Wo).reshape(1, -1),
            jnp.tile(b2, Wo).reshape(1, -1),
            _bands_stride1(p["w2"], Wo),
        ]
        shortcut = (i == 0 and not equal)
        if shortcut:
            layer_inputs.append(_band_1x1(p["wsc"], Wo if s == 2 else W))
        inputs.extend(layer_inputs)
        in_specs.extend(_const_spec(a) for a in layer_inputs)
        layer_meta.append((s, equal, shortcut))

    def kernel(*refs):
        x_ref, shifts_ref, o_ref = refs[0], refs[1], refs[-1]
        it = iter(refs[2:-1])

        f32, bf16 = jnp.float32, jnp.bfloat16
        sdn = shifts_ref[0]                     # [Ho, Ho]
        sup = shifts_ref[1]

        def mm(a, b_ref_val):                   # bf16 x bf16 -> f32 on the MXU
            return jnp.dot(a.astype(bf16), b_ref_val, preferred_element_type=f32)

        def conv3x3_s1(a, band_ref):
            # a: [h, width*Cin] f32 lane-packed; band_ref: [3, width*Cin, width*Cout] bf16
            a_dn = jnp.dot(sdn, a, preferred_element_type=f32)
            a_up = jnp.dot(sup, a, preferred_element_type=f32)
            return mm(a_dn, band_ref[0]) + mm(a, band_ref[1]) + mm(a_up, band_ref[2])

        cur = None
        for i, (s, equal, shortcut) in enumerate(layer_meta):
            s1_ref, b1_ref, band1_ref = next(it), next(it), next(it)
            s2_ref, b2_ref, band2_ref = next(it), next(it), next(it)
            bsc_ref = next(it) if shortcut else None

            if i == 0 and s == 2:
                # relu(bn1(x)) applied per polyphase component (elementwise, f32)
                s1v, b1v = s1_ref[...], b1_ref[...]
                a_ee = jnp.maximum(x_ref[0] * s1v + b1v, 0.0)
                a_eo = jnp.maximum(x_ref[1] * s1v + b1v, 0.0)
                a_oe = jnp.maximum(x_ref[2] * s1v + b1v, 0.0)
                a_oo = jnp.maximum(x_ref[3] * s1v + b1v, 0.0)
                # stride-2 3x3 conv = 6 banded matmuls over the polyphase components
                a_oe_dn = jnp.dot(sdn, a_oe, preferred_element_type=f32)
                a_oo_dn = jnp.dot(sdn, a_oo, preferred_element_type=f32)
                h = (mm(a_oe_dn, band1_ref[0]) + mm(a_oo_dn, band1_ref[1]) +
                     mm(a_ee, band1_ref[2]) + mm(a_eo, band1_ref[3]) +
                     mm(a_oe, band1_ref[4]) + mm(a_oo, band1_ref[5]))
                res = mm(a_ee, bsc_ref[...])     # 1x1 stride-2 shortcut conv (direct)
            else:
                xin = x_ref[...] if i == 0 else cur
                a = jnp.maximum(xin * s1_ref[...] + b1_ref[...], 0.0)
                h = conv3x3_s1(a, band1_ref)
                if shortcut:                     # first layer, stride 1, cin != cout
                    res = mm(a, bsc_ref[...])
                else:
                    res = xin                    # identity residual (pre-BN input)

            h = jnp.maximum(h * s2_ref[...] + b2_ref[...], 0.0)
            # TODO(synk): F.dropout omitted - dropRate=0.0 (module default) / eval mode
            # makes it an exact identity here.
            cur = conv3x3_s1(h, band2_ref) + res

        o_ref[...] = cur.astype(o_ref.dtype)

    out = pl.pallas_call(
        kernel,
        out_shape=jax.ShapeDtypeStruct((N, Ho, Wo * C1), x.dtype),
        grid=(N,),
        in_specs=in_specs,
        out_specs=pl.BlockSpec((None, Ho, Wo * C1), lambda n: (n, 0, 0)),
        compiler_params=pltpu.CompilerParams(dimension_semantics=("parallel",)),
    )(*inputs)
    return out.reshape(N, Ho, Wo, C1)


# ------------------------------ plain-JAX reference -------------------------------

def _conv_ref(x, w, stride, pad):
    return jax.lax.conv_general_dilated(
        x, w, window_strides=(stride, stride),
        padding=((pad, pad), (pad, pad)),
        dimension_numbers=("NHWC", "HWIO", "NHWC"),
        precision=jax.lax.Precision.HIGHEST)


def _bn_relu_ref(v, gamma, beta, mean, var):
    s = gamma / jnp.sqrt(var + _EPS)
    return jnp.maximum(v * s + (beta - mean * s), 0.0)


def basic_block_ref(x, p, stride, equal_in_out):
    a = _bn_relu_ref(x, p["gamma1"], p["beta1"], p["mean1"], p["var1"])
    h = _conv_ref(a, p["w1"], stride, 1)
    h = _bn_relu_ref(h, p["gamma2"], p["beta2"], p["mean2"], p["var2"])
    if equal_in_out:
        res = x
    else:
        wsc = p["wsc"].reshape(1, 1, *p["wsc"].shape)
        res = _conv_ref(a, wsc, stride, 0)
    return _conv_ref(h, p["w2"], 1, 1) + res


def network_block_ref(x, params, in_planes, out_planes, stride):
    h = x
    for i, p in enumerate(params):
        cin = in_planes if i == 0 else out_planes
        s = stride if i == 0 else 1
        h = basic_block_ref(h, p, s, cin == out_planes)
    return h


# ---------------------------------- param init -------------------------------------

def init_basic_block_params(key, cin, cout):
    ks = jax.random.split(key, 16)
    p = dict(
        gamma1=1.0 + 0.1 * jax.random.normal(ks[0], (cin,), jnp.float32),
        beta1=0.05 * jax.random.normal(ks[1], (cin,), jnp.float32),
        mean1=0.1 * jax.random.normal(ks[2], (cin,), jnp.float32),
        var1=jax.random.uniform(ks[3], (cin,), jnp.float32, 0.5, 1.5),
        w1=jax.random.normal(ks[4], (3, 3, cin, cout), jnp.float32)
           * math.sqrt(2.0 / (9 * cout)),
        gamma2=1.0 + 0.1 * jax.random.normal(ks[5], (cout,), jnp.float32),
        beta2=0.05 * jax.random.normal(ks[6], (cout,), jnp.float32),
        mean2=0.1 * jax.random.normal(ks[7], (cout,), jnp.float32),
        var2=jax.random.uniform(ks[8], (cout,), jnp.float32, 0.5, 1.5),
        w2=jax.random.normal(ks[9], (3, 3, cout, cout), jnp.float32)
           * math.sqrt(2.0 / (9 * cout)),
    )
    if cin != cout:
        p["wsc"] = (jax.random.normal(ks[10], (cin, cout), jnp.float32)
                    * math.sqrt(2.0 / cout))
    return p


# ------------------------------------- main ------------------------------------------

if __name__ == "__main__":
    # NetworkBlock(nb_layers=2, in_planes=8, out_planes=16, block=BasicBlock,
    #              stride=2, dropRate=0.0)
    nb_layers, in_planes, out_planes, stride = 2, 8, 16, 2
    N, H, W = 2, 16, 16

    root = jax.random.PRNGKey(0)
    kx, kp = jax.random.split(root)
    x_nchw = jax.random.normal(kx, (N, in_planes, H, W), jnp.float32)
    x = jnp.transpose(x_nchw, (0, 2, 3, 1))  # NCHW -> NHWC

    layer_keys = jax.random.split(kp, nb_layers)
    params = []
    for i in range(nb_layers):
        cin = in_planes if i == 0 else out_planes
        params.append(init_basic_block_params(layer_keys[i], cin, out_planes))

    fwd = jax.jit(lambda xx: network_block_forward(
        xx, params, in_planes, out_planes, stride))
    out = jax.block_until_ready(fwd(x))

    ref = network_block_ref(x, params, in_planes, out_planes, stride)
    assert out.shape == ref.shape == (N, H // stride, W // stride, out_planes)
    err = float(jnp.max(jnp.abs(out - ref) / (1.0 + jnp.abs(ref))))
    assert err < 5e-2, f"mismatch vs reference: max scaled err {err}"

    print("KERNEL_OK")
</pallas_src>

<mosaic_0001>
module attributes {stable_mosaic.version = 11 : i64} {
  func.func @kernel(%arg0: i32, %arg1: memref<1x4x8x64xf32, #tpu.memory_space<vmem>>, %arg2: memref<2x8x8xf32, #tpu.memory_space<vmem>>, %arg3: memref<1x64xf32, #tpu.memory_space<vmem>>, %arg4: memref<1x64xf32, #tpu.memory_space<vmem>>, %arg5: memref<6x64x128xbf16, #tpu.memory_space<vmem>>, %arg6: memref<1x128xf32, #tpu.memory_space<vmem>>, %arg7: memref<1x128xf32, #tpu.memory_space<vmem>>, %arg8: memref<3x128x128xbf16, #tpu.memory_space<vmem>>, %arg9: memref<64x128xbf16, #tpu.memory_space<vmem>>, %arg10: memref<1x128xf32, #tpu.memory_space<vmem>>, %arg11: memref<1x128xf32, #tpu.memory_space<vmem>>, %arg12: memref<3x128x128xbf16, #tpu.memory_space<vmem>>, %arg13: memref<1x128xf32, #tpu.memory_space<vmem>>, %arg14: memref<1x128xf32, #tpu.memory_space<vmem>>, %arg15: memref<3x128x128xbf16, #tpu.memory_space<vmem>>, %arg16: memref<1x8x128xf32, #tpu.memory_space<vmem>>) attributes {dimension_semantics = [#tpu.dimension_semantics<parallel>], iteration_bounds = array<i64: 2>, scalar_prefetch = 0 : i64, scratch_operands = 0 : i64, tpu.core_type = #tpu.core_type<tc>, window_params = [{transform_indices = @transform_0, window_bounds = array<i64: 1, 4, 8, 64>}, {pipeline_mode = #tpu.pipeline_mode<synchronous>, transform_indices = @transform_1, window_bounds = array<i64: 2, 8, 8>}, {pipeline_mode = #tpu.pipeline_mode<synchronous>, transform_indices = @transform_2, window_bounds = array<i64: 1, 64>}, {pipeline_mode = #tpu.pipeline_mode<synchronous>, transform_indices = @transform_3, window_bounds = array<i64: 1, 64>}, {pipeline_mode = #tpu.pipeline_mode<synchronous>, transform_indices = @transform_4, window_bounds = array<i64: 6, 64, 128>}, {pipeline_mode = #tpu.pipeline_mode<synchronous>, transform_indices = @transform_5, window_bounds = array<i64: 1, 128>}, {pipeline_mode = #tpu.pipeline_mode<synchronous>, transform_indices = @transform_6, window_bounds = array<i64: 1, 128>}, {pipeline_mode = #tpu.pipeline_mode<synchronous>, transform_indices = @transform_7, window_bounds = array<i64: 3, 128, 128>}, {pipeline_mode = #tpu.pipeline_mode<synchronous>, transform_indices = @transform_8, window_bounds = array<i64: 64, 128>}, {pipeline_mode = #tpu.pipeline_mode<synchronous>, transform_indices = @transform_9, window_bounds = array<i64: 1, 128>}, {pipeline_mode = #tpu.pipeline_mode<synchronous>, transform_indices = @transform_10, window_bounds = array<i64: 1, 128>}, {pipeline_mode = #tpu.pipeline_mode<synchronous>, transform_indices = @transform_11, window_bounds = array<i64: 3, 128, 128>}, {pipeline_mode = #tpu.pipeline_mode<synchronous>, transform_indices = @transform_12, window_bounds = array<i64: 1, 128>}, {pipeline_mode = #tpu.pipeline_mode<synchronous>, transform_indices = @transform_13, window_bounds = array<i64: 1, 128>}, {pipeline_mode = #tpu.pipeline_mode<synchronous>, transform_indices = @transform_14, window_bounds = array<i64: 3, 128, 128>}, {transform_indices = @transform_15, window_bounds = array<i64: 1, 8, 128>}]} {
    %c0 = arith.constant 0 : index
    %c0_0 = arith.constant 0 : index
    %c0_1 = arith.constant 0 : index
    %0 = vector.load %arg2[%c0, %c0_0, %c0_1] : memref<2x8x8xf32, #tpu.memory_space<vmem>>, vector<1x8x8xf32>
    %1 = vector.shape_cast %0 : vector<1x8x8xf32> to vector<8x8xf32>
    %c1 = arith.constant 1 : index
    %c0_2 = arith.constant 0 : index
    %c0_3 = arith.constant 0 : index
    %2 = vector.load %arg2[%c1, %c0_2, %c0_3] : memref<2x8x8xf32, #tpu.memory_space<vmem>>, vector<1x8x8xf32>
    %3 = vector.shape_cast %2 : vector<1x8x8xf32> to vector<8x8xf32>
    %c0_4 = arith.constant 0 : index
    %c0_5 = arith.constant 0 : index
    %4 = vector.load %arg3[%c0_4, %c0_5] : memref<1x64xf32, #tpu.memory_space<vmem>>, vector<1x64xf32>
    %c0_6 = arith.constant 0 : index
    %c0_7 = arith.constant 0 : index
    %5 = vector.load %arg4[%c0_6, %c0_7] : memref<1x64xf32, #tpu.memory_space<vmem>>, vector<1x64xf32>
    %c0_8 = arith.constant 0 : index
    %c0_9 = arith.constant 0 : index
    %c0_10 = arith.constant 0 : index
    %c0_11 = arith.constant 0 : index
    %6 = vector.load %arg1[%c0_8, %c0_9, %c0_10, %c0_11] : memref<1x4x8x64xf32, #tpu.memory_space<vmem>>, vector<1x1x8x64xf32>
    %7 = vector.shape_cast %6 : vector<1x1x8x64xf32> to vector<8x64xf32>
    %8 = vector.broadcast %4 : vector<1x64xf32> to vector<8x64xf32>
    %9 = arith.mulf %7, %8 : vector<8x64xf32>
    %10 = vector.broadcast %5 : vector<1x64xf32> to vector<8x64xf32>
    %11 = arith.addf %9, %10 : vector<8x64xf32>
    %cst = arith.constant 0.000000e+00 : f32
    %12 = vector.broadcast %cst : f32 to vector<8x64xf32>
    %13 = arith.maximumf %11, %12 : vector<8x64xf32>
    %c0_12 = arith.constant 0 : index
    %c1_13 = arith.constant 1 : index
    %c0_14 = arith.constant 0 : index
    %c0_15 = arith.constant 0 : index
    %14 = vector.load %arg1[%c0_12, %c1_13, %c0_14, %c0_15] : memref<1x4x8x64xf32, #tpu.memory_space<vmem>>, vector<1x1x8x64xf32>
    %15 = vector.shape_cast %14 : vector<1x1x8x64xf32> to vector<8x64xf32>
    %16 = vector.broadcast %4 : vector<1x64xf32> to vector<8x64xf32>
    %17 = arith.mulf %15, %16 : vector<8x64xf32>
    %18 = vector.broadcast %5 : vector<1x64xf32> to vector<8x64xf32>
    %19 = arith.addf %17, %18 : vector<8x64xf32>
    %cst_16 = arith.constant 0.000000e+00 : f32
    %20 = vector.broadcast %cst_16 : f32 to vector<8x64xf32>
    %21 = arith.maximumf %19, %20 : vector<8x64xf32>
    %c0_17 = arith.constant 0 : index
    %c2 = arith.constant 2 : index
    %c0_18 = arith.constant 0 : index
    %c0_19 = arith.constant 0 : index
    %22 = vector.load %arg1[%c0_17, %c2, %c0_18, %c0_19] : memref<1x4x8x64xf32, #tpu.memory_space<vmem>>, vector<1x1x8x64xf32>
    %23 = vector.shape_cast %22 : vector<1x1x8x64xf32> to vector<8x64xf32>
    %24 = vector.broadcast %4 : vector<1x64xf32> to vector<8x64xf32>
    %25 = arith.mulf %23, %24 : vector<8x64xf32>
    %26 = vector.broadcast %5 : vector<1x64xf32> to vector<8x64xf32>
    %27 = arith.addf %25, %26 : vector<8x64xf32>
    %cst_20 = arith.constant 0.000000e+00 : f32
    %28 = vector.broadcast %cst_20 : f32 to vector<8x64xf32>
    %29 = arith.maximumf %27, %28 : vector<8x64xf32>
    %c0_21 = arith.constant 0 : index
    %c3 = arith.constant 3 : index
    %c0_22 = arith.constant 0 : index
    %c0_23 = arith.constant 0 : index
    %30 = vector.load %arg1[%c0_21, %c3, %c0_22, %c0_23] : memref<1x4x8x64xf32, #tpu.memory_space<vmem>>, vector<1x1x8x64xf32>
    %31 = vector.shape_cast %30 : vector<1x1x8x64xf32> to vector<8x64xf32>
    %32 = vector.broadcast %4 : vector<1x64xf32> to vector<8x64xf32>
    %33 = arith.mulf %31, %32 : vector<8x64xf32>
    %34 = vector.broadcast %5 : vector<1x64xf32> to vector<8x64xf32>
    %35 = arith.addf %33, %34 : vector<8x64xf32>
    %cst_24 = arith.constant 0.000000e+00 : f32
    %36 = vector.broadcast %cst_24 : f32 to vector<8x64xf32>
    %37 = arith.maximumf %35, %36 : vector<8x64xf32>
    %cst_25 = arith.constant dense<0.000000e+00> : vector<8x64xf32>
    %38 = tpu.matmul %1, %29, %cst_25 {dimension_numbers = #tpu.dot_dimension_numbers<[1], [0], [0], [1], [0, 0, 1, 1], [], []>} : vector<8x8xf32>, vector<8x64xf32>, vector<8x64xf32> -> vector<8x64xf32>
    %cst_26 = arith.constant dense<0.000000e+00> : vector<8x64xf32>
    %39 = tpu.matmul %1, %37, %cst_26 {dimension_numbers = #tpu.dot_dimension_numbers<[1], [0], [0], [1], [0, 0, 1, 1], [], []>} : vector<8x8xf32>, vector<8x64xf32>, vector<8x64xf32> -> vector<8x64xf32>
    %c0_27 = arith.constant 0 : index
    %c0_28 = arith.constant 0 : index
    %c0_29 = arith.constant 0 : index
    %40 = vector.load %arg5[%c0_27, %c0_28, %c0_29] : memref<6x64x128xbf16, #tpu.memory_space<vmem>>, vector<1x64x128xbf16>
    %41 = vector.shape_cast %40 : vector<1x64x128xbf16> to vector<64x128xbf16>
    %42 = arith.truncf %38 : vector<8x64xf32> to vector<8x64xbf16>
    %cst_30 = arith.constant dense<0.000000e+00> : vector<8x128xf32>
    %43 = tpu.matmul %42, %41, %cst_30 {dimension_numbers = #tpu.dot_dimension_numbers<[1], [0], [0], [1], [0, 0, 1, 1], [], []>} : vector<8x64xbf16>, vector<64x128xbf16>, vector<8x128xf32> -> vector<8x128xf32>
    %c1_31 = arith.constant 1 : index
    %c0_32 = arith.constant 0 : index
    %c0_33 = arith.constant 0 : index
    %44 = vector.load %arg5[%c1_31, %c0_32, %c0_33] : memref<6x64x128xbf16, #tpu.memory_space<vmem>>, vector<1x64x128xbf16>
    %45 = vector.shape_cast %44 : vector<1x64x128xbf16> to vector<64x128xbf16>
    %46 = arith.truncf %39 : vector<8x64xf32> to vector<8x64xbf16>
    %cst_34 = arith.constant dense<0.000000e+00> : vector<8x128xf32>
    %47 = tpu.matmul %46, %45, %cst_34 {dimension_numbers = #tpu.dot_dimension_numbers<[1], [0], [0], [1], [0, 0, 1, 1], [], []>} : vector<8x64xbf16>, vector<64x128xbf16>, vector<8x128xf32> -> vector<8x128xf32>
    %48 = arith.addf %43, %47 : vector<8x128xf32>
    %c2_35 = arith.constant 2 : index
    %c0_36 = arith.constant 0 : index
    %c0_37 = arith.constant 0 : index
    %49 = vector.load %arg5[%c2_35, %c0_36, %c0_37] : memref<6x64x128xbf16, #tpu.memory_space<vmem>>, vector<1x64x128xbf16>
    %50 = vector.shape_cast %49 : vector<1x64x128xbf16> to vector<64x128xbf16>
    %51 = arith.truncf %13 : vector<8x64xf32> to vector<8x64xbf16>
    %cst_38 = arith.constant dense<0.000000e+00> : vector<8x128xf32>
    %52 = tpu.matmul %51, %50, %cst_38 {dimension_numbers = #tpu.dot_dimension_numbers<[1], [0], [0], [1], [0, 0, 1, 1], [], []>} : vector<8x64xbf16>, vector<64x128xbf16>, vector<8x128xf32> -> vector<8x128xf32>
    %53 = arith.addf %48, %52 : vector<8x128xf32>
    %c3_39 = arith.constant 3 : index
    %c0_40 = arith.constant 0 : index
    %c0_41 = arith.constant 0 : index
    %54 = vector.load %arg5[%c3_39, %c0_40, %c0_41] : memref<6x64x128xbf16, #tpu.memory_space<vmem>>, vector<1x64x128xbf16>
    %55 = vector.shape_cast %54 : vector<1x64x128xbf16> to vector<64x128xbf16>
    %56 = arith.truncf %21 : vector<8x64xf32> to vector<8x64xbf16>
    %cst_42 = arith.constant dense<0.000000e+00> : vector<8x128xf32>
    %57 = tpu.matmul %56, %55, %cst_42 {dimension_numbers = #tpu.dot_dimension_numbers<[1], [0], [0], [1], [0, 0, 1, 1], [], []>} : vector<8x64xbf16>, vector<64x128xbf16>, vector<8x128xf32> -> vector<8x128xf32>
    %58 = arith.addf %53, %57 : vector<8x128xf32>
    %c4 = arith.constant 4 : index
    %c0_43 = arith.constant 0 : index
    %c0_44 = arith.constant 0 : index
    %59 = vector.load %arg5[%c4, %c0_43, %c0_44] : memref<6x64x128xbf16, #tpu.memory_space<vmem>>, vector<1x64x128xbf16>
    %60 = vector.shape_cast %59 : vector<1x64x128xbf16> to vector<64x128xbf16>
    %61 = arith.truncf %29 : vector<8x64xf32> to vector<8x64xbf16>
    %cst_45 = arith.constant dense<0.000000e+00> : vector<8x128xf32>
    %62 = tpu.matmul %61, %60, %cst_45 {dimension_numbers = #tpu.dot_dimension_numbers<[1], [0], [0], [1], [0, 0, 1, 1], [], []>} : vector<8x64xbf16>, vector<64x128xbf16>, vector<8x128xf32> -> vector<8x128xf32>
    %63 = arith.addf %58, %62 : vector<8x128xf32>
    %c5 = arith.constant 5 : index
    %c0_46 = arith.constant 0 : index
    %c0_47 = arith.constant 0 : index
    %64 = vector.load %arg5[%c5, %c0_46, %c0_47] : memref<6x64x128xbf16, #tpu.memory_space<vmem>>, vector<1x64x128xbf16>
    %65 = vector.shape_cast %64 : vector<1x64x128xbf16> to vector<64x128xbf16>
    %66 = arith.truncf %37 : vector<8x64xf32> to vector<8x64xbf16>
    %cst_48 = arith.constant dense<0.000000e+00> : vector<8x128xf32>
    %67 = tpu.matmul %66, %65, %cst_48 {dimension_numbers = #tpu.dot_dimension_numbers<[1], [0], [0], [1], [0, 0, 1, 1], [], []>} : vector<8x64xbf16>, vector<64x128xbf16>, vector<8x128xf32> -> vector<8x128xf32>
    %68 = arith.addf %63, %67 : vector<8x128xf32>
    %c0_49 = arith.constant 0 : index
    %c0_50 = arith.constant 0 : index
    %69 = vector.load %arg9[%c0_49, %c0_50] : memref<64x128xbf16, #tpu.memory_space<vmem>>, vector<64x128xbf16>
    %70 = arith.truncf %13 : vector<8x64xf32> to vector<8x64xbf16>
    %cst_51 = arith.constant dense<0.000000e+00> : vector<8x128xf32>
    %71 = tpu.matmul %70, %69, %cst_51 {dimension_numbers = #tpu.dot_dimension_numbers<[1], [0], [0], [1], [0, 0, 1, 1], [], []>} : vector<8x64xbf16>, vector<64x128xbf16>, vector<8x128xf32> -> vector<8x128xf32>
    %c0_52 = arith.constant 0 : index
    %c0_53 = arith.constant 0 : index
    %72 = vector.load %arg6[%c0_52, %c0_53] : memref<1x128xf32, #tpu.memory_space<vmem>>, vector<1x128xf32>
    %73 = vector.broadcast %72 : vector<1x128xf32> to vector<8x128xf32>
    %74 = arith.mulf %68, %73 : vector<8x128xf32>
    %c0_54 = arith.constant 0 : index
    %c0_55 = arith.constant 0 : index
    %75 = vector.load %arg7[%c0_54, %c0_55] : memref<1x128xf32, #tpu.memory_space<vmem>>, vector<1x128xf32>
    %76 = vector.broadcast %75 : vector<1x128xf32> to vector<8x128xf32>
    %77 = arith.addf %74, %76 : vector<8x128xf32>
    %cst_56 = arith.constant 0.000000e+00 : f32
    %78 = vector.broadcast %cst_56 : f32 to vector<8x128xf32>
    %79 = arith.maximumf %77, %78 : vector<8x128xf32>
    %cst_57 = arith.constant dense<0.000000e+00> : vector<8x128xf32>
    %80 = tpu.matmul %1, %79, %cst_57 {dimension_numbers = #tpu.dot_dimension_numbers<[1], [0], [0], [1], [0, 0, 1, 1], [], []>} : vector<8x8xf32>, vector<8x128xf32>, vector<8x128xf32> -> vector<8x128xf32>
    %cst_58 = arith.constant dense<0.000000e+00> : vector<8x128xf32>
    %81 = tpu.matmul %3, %79, %cst_58 {dimension_numbers = #tpu.dot_dimension_numbers<[1], [0], [0], [1], [0, 0, 1, 1], [], []>} : vector<8x8xf32>, vector<8x128xf32>, vector<8x128xf32> -> vector<8x128xf32>
    %c0_59 = arith.constant 0 : index
    %c0_60 = arith.constant 0 : index
    %c0_61 = arith.constant 0 : index
    %82 = vector.load %arg8[%c0_59, %c0_60, %c0_61] : memref<3x128x128xbf16, #tpu.memory_space<vmem>>, vector<1x128x128xbf16>
    %83 = vector.shape_cast %82 : vector<1x128x128xbf16> to vector<128x128xbf16>
    %84 = arith.truncf %80 : vector<8x128xf32> to vector<8x128xbf16>
    %cst_62 = arith.constant dense<0.000000e+00> : vector<8x128xf32>
    %85 = tpu.matmul %84, %83, %cst_62 {dimension_numbers = #tpu.dot_dimension_numbers<[1], [0], [0], [1], [0, 0, 1, 1], [], []>} : vector<8x128xbf16>, vector<128x128xbf16>, vector<8x128xf32> -> vector<8x128xf32>
    %c1_63 = arith.constant 1 : index
    %c0_64 = arith.constant 0 : index
    %c0_65 = arith.constant 0 : index
    %86 = vector.load %arg8[%c1_63, %c0_64, %c0_65] : memref<3x128x128xbf16, #tpu.memory_space<vmem>>, vector<1x128x128xbf16>
    %87 = vector.shape_cast %86 : vector<1x128x128xbf16> to vector<128x128xbf16>
    %88 = arith.truncf %79 : vector<8x128xf32> to vector<8x128xbf16>
    %cst_66 = arith.constant dense<0.000000e+00> : vector<8x128xf32>
    %89 = tpu.matmul %88, %87, %cst_66 {dimension_numbers = #tpu.dot_dimension_numbers<[1], [0], [0], [1], [0, 0, 1, 1], [], []>} : vector<8x128xbf16>, vector<128x128xbf16>, vector<8x128xf32> -> vector<8x128xf32>
    %90 = arith.addf %85, %89 : vector<8x128xf32>
    %c2_67 = arith.constant 2 : index
    %c0_68 = arith.constant 0 : index
    %c0_69 = arith.constant 0 : index
    %91 = vector.load %arg8[%c2_67, %c0_68, %c0_69] : memref<3x128x128xbf16, #tpu.memory_space<vmem>>, vector<1x128x128xbf16>
    %92 = vector.shape_cast %91 : vector<1x128x128xbf16> to vector<128x128xbf16>
    %93 = arith.truncf %81 : vector<8x128xf32> to vector<8x128xbf16>
    %cst_70 = arith.constant dense<0.000000e+00> : vector<8x128xf32>
    %94 = tpu.matmul %93, %92, %cst_70 {dimension_numbers = #tpu.dot_dimension_numbers<[1], [0], [0], [1], [0, 0, 1, 1], [], []>} : vector<8x128xbf16>, vector<128x128xbf16>, vector<8x128xf32> -> vector<8x128xf32>
    %95 = arith.addf %90, %94 : vector<8x128xf32>
    %96 = arith.addf %95, %71 : vector<8x128xf32>
    %c0_71 = arith.constant 0 : index
    %c0_72 = arith.constant 0 : index
    %97 = vector.load %arg10[%c0_71, %c0_72] : memref<1x128xf32, #tpu.memory_space<vmem>>, vector<1x128xf32>
    %98 = vector.broadcast %97 : vector<1x128xf32> to vector<8x128xf32>
    %99 = arith.mulf %96, %98 : vector<8x128xf32>
    %c0_73 = arith.constant 0 : index
    %c0_74 = arith.constant 0 : index
    %100 = vector.load %arg11[%c0_73, %c0_74] : memref<1x128xf32, #tpu.memory_space<vmem>>, vector<1x128xf32>
    %101 = vector.broadcast %100 : vector<1x128xf32> to vector<8x128xf32>
    %102 = arith.addf %99, %101 : vector<8x128xf32>
    %cst_75 = arith.constant 0.000000e+00 : f32
    %103 = vector.broadcast %cst_75 : f32 to vector<8x128xf32>
    %104 = arith.maximumf %102, %103 : vector<8x128xf32>
    %cst_76 = arith.constant dense<0.000000e+00> : vector<8x128xf32>
    %105 = tpu.matmul %1, %104, %cst_76 {dimension_numbers = #tpu.dot_dimension_numbers<[1], [0], [0], [1], [0, 0, 1, 1], [], []>} : vector<8x8xf32>, vector<8x128xf32>, vector<8x128xf32> -> vector<8x128xf32>
    %cst_77 = arith.constant dense<0.000000e+00> : vector<8x128xf32>
    %106 = tpu.matmul %3, %104, %cst_77 {dimension_numbers = #tpu.dot_dimension_numbers<[1], [0], [0], [1], [0, 0, 1, 1], [], []>} : vector<8x8xf32>, vector<8x128xf32>, vector<8x128xf32> -> vector<8x128xf32>
    %c0_78 = arith.constant 0 : index
    %c0_79 = arith.constant 0 : index
    %c0_80 = arith.constant 0 : index
    %107 = vector.load %arg12[%c0_78, %c0_79, %c0_80] : memref<3x128x128xbf16, #tpu.memory_space<vmem>>, vector<1x128x128xbf16>
    %108 = vector.shape_cast %107 : vector<1x128x128xbf16> to vector<128x128xbf16>
    %109 = arith.truncf %105 : vector<8x128xf32> to vector<8x128xbf16>
    %cst_81 = arith.constant dense<0.000000e+00> : vector<8x128xf32>
    %110 = tpu.matmul %109, %108, %cst_81 {dimension_numbers = #tpu.dot_dimension_numbers<[1], [0], [0], [1], [0, 0, 1, 1], [], []>} : vector<8x128xbf16>, vector<128x128xbf16>, vector<8x128xf32> -> vector<8x128xf32>
    %c1_82 = arith.constant 1 : index
    %c0_83 = arith.constant 0 : index
    %c0_84 = arith.constant 0 : index
    %111 = vector.load %arg12[%c1_82, %c0_83, %c0_84] : memref<3x128x128xbf16, #tpu.memory_space<vmem>>, vector<1x128x128xbf16>
    %112 = vector.shape_cast %111 : vector<1x128x128xbf16> to vector<128x128xbf16>
    %113 = arith.truncf %104 : vector<8x128xf32> to vector<8x128xbf16>
    %cst_85 = arith.constant dense<0.000000e+00> : vector<8x128xf32>
    %114 = tpu.matmul %113, %112, %cst_85 {dimension_numbers = #tpu.dot_dimension_numbers<[1], [0], [0], [1], [0, 0, 1, 1], [], []>} : vector<8x128xbf16>, vector<128x128xbf16>, vector<8x128xf32> -> vector<8x128xf32>
    %115 = arith.addf %110, %114 : vector<8x128xf32>
    %c2_86 = arith.constant 2 : index
    %c0_87 = arith.constant 0 : index
    %c0_88 = arith.constant 0 : index
    %116 = vector.load %arg12[%c2_86, %c0_87, %c0_88] : memref<3x128x128xbf16, #tpu.memory_space<vmem>>, vector<1x128x128xbf16>
    %117 = vector.shape_cast %116 : vector<1x128x128xbf16> to vector<128x128xbf16>
    %118 = arith.truncf %106 : vector<8x128xf32> to vector<8x128xbf16>
    %cst_89 = arith.constant dense<0.000000e+00> : vector<8x128xf32>
    %119 = tpu.matmul %118, %117, %cst_89 {dimension_numbers = #tpu.dot_dimension_numbers<[1], [0], [0], [1], [0, 0, 1, 1], [], []>} : vector<8x128xbf16>, vector<128x128xbf16>, vector<8x128xf32> -> vector<8x128xf32>
    %120 = arith.addf %115, %119 : vector<8x128xf32>
    %c0_90 = arith.constant 0 : index
    %c0_91 = arith.constant 0 : index
    %121 = vector.load %arg13[%c0_90, %c0_91] : memref<1x128xf32, #tpu.memory_space<vmem>>, vector<1x128xf32>
    %122 = vector.broadcast %121 : vector<1x128xf32> to vector<8x128xf32>
    %123 = arith.mulf %120, %122 : vector<8x128xf32>
    %c0_92 = arith.constant 0 : index
    %c0_93 = arith.constant 0 : index
    %124 = vector.load %arg14[%c0_92, %c0_93] : memref<1x128xf32, #tpu.memory_space<vmem>>, vector<1x128xf32>
    %125 = vector.broadcast %124 : vector<1x128xf32> to vector<8x128xf32>
    %126 = arith.addf %123, %125 : vector<8x128xf32>
    %cst_94 = arith.constant 0.000000e+00 : f32
    %127 = vector.broadcast %cst_94 : f32 to vector<8x128xf32>
    %128 = arith.maximumf %126, %127 : vector<8x128xf32>
    %cst_95 = arith.constant dense<0.000000e+00> : vector<8x128xf32>
    %129 = tpu.matmul %1, %128, %cst_95 {dimension_numbers = #tpu.dot_dimension_numbers<[1], [0], [0], [1], [0, 0, 1, 1], [], []>} : vector<8x8xf32>, vector<8x128xf32>, vector<8x128xf32> -> vector<8x128xf32>
    %cst_96 = arith.constant dense<0.000000e+00> : vector<8x128xf32>
    %130 = tpu.matmul %3, %128, %cst_96 {dimension_numbers = #tpu.dot_dimension_numbers<[1], [0], [0], [1], [0, 0, 1, 1], [], []>} : vector<8x8xf32>, vector<8x128xf32>, vector<8x128xf32> -> vector<8x128xf32>
    %c0_97 = arith.constant 0 : index
    %c0_98 = arith.constant 0 : index
    %c0_99 = arith.constant 0 : index
    %131 = vector.load %arg15[%c0_97, %c0_98, %c0_99] : memref<3x128x128xbf16, #tpu.memory_space<vmem>>, vector<1x128x128xbf16>
    %132 = vector.shape_cast %131 : vector<1x128x128xbf16> to vector<128x128xbf16>
    %133 = arith.truncf %129 : vector<8x128xf32> to vector<8x128xbf16>
    %cst_100 = arith.constant dense<0.000000e+00> : vector<8x128xf32>
    %134 = tpu.matmul %133, %132, %cst_100 {dimension_numbers = #tpu.dot_dimension_numbers<[1], [0], [0], [1], [0, 0, 1, 1], [], []>} : vector<8x128xbf16>, vector<128x128xbf16>, vector<8x128xf32> -> vector<8x128xf32>
    %c1_101 = arith.constant 1 : index
    %c0_102 = arith.constant 0 : index
    %c0_103 = arith.constant 0 : index
    %135 = vector.load %arg15[%c1_101, %c0_102, %c0_103] : memref<3x128x128xbf16, #tpu.memory_space<vmem>>, vector<1x128x128xbf16>
    %136 = vector.shape_cast %135 : vector<1x128x128xbf16> to vector<128x128xbf16>
    %137 = arith.truncf %128 : vector<8x128xf32> to vector<8x128xbf16>
    %cst_104 = arith.constant dense<0.000000e+00> : vector<8x128xf32>
    %138 = tpu.matmul %137, %136, %cst_104 {dimension_numbers = #tpu.dot_dimension_numbers<[1], [0], [0], [1], [0, 0, 1, 1], [], []>} : vector<8x128xbf16>, vector<128x128xbf16>, vector<8x128xf32> -> vector<8x128xf32>
    %139 = arith.addf %134, %138 : vector<8x128xf32>
    %c2_105 = arith.constant 2 : index
    %c0_106 = arith.constant 0 : index
    %c0_107 = arith.constant 0 : index
    %140 = vector.load %arg15[%c2_105, %c0_106, %c0_107] : memref<3x128x128xbf16, #tpu.memory_space<vmem>>, vector<1x128x128xbf16>
    %141 = vector.shape_cast %140 : vector<1x128x128xbf16> to vector<128x128xbf16>
    %142 = arith.truncf %130 : vector<8x128xf32> to vector<8x128xbf16>
    %cst_108 = arith.constant dense<0.000000e+00> : vector<8x128xf32>
    %143 = tpu.matmul %142, %141, %cst_108 {dimension_numbers = #tpu.dot_dimension_numbers<[1], [0], [0], [1], [0, 0, 1, 1], [], []>} : vector<8x128xbf16>, vector<128x128xbf16>, vector<8x128xf32> -> vector<8x128xf32>
    %144 = arith.addf %139, %143 : vector<8x128xf32>
    %145 = arith.addf %144, %96 : vector<8x128xf32>
    %c0_109 = arith.constant 0 : index
    %c0_110 = arith.constant 0 : index
    %c0_111 = arith.constant 0 : index
    %146 = vector.load %arg16[%c0_109, %c0_110, %c0_111] : memref<1x8x128xf32, #tpu.memory_space<vmem>>, vector<1x8x128xf32>
    %147 = vector.shape_cast %146 : vector<1x8x128xf32> to vector<8x128xf32>
    %148 = vector.shape_cast %145 : vector<8x128xf32> to vector<1x8x128xf32>
    tpu.vector_store %arg16[%c0_109, %c0_110, %c0_111], %148 {strides = array<i32>} : memref<1x8x128xf32, #tpu.memory_space<vmem>>, vector<1x8x128xf32>,
    return
  }
  func.func @transform_0(%arg0: i32) -> (i32, i32, i32, i32) {
    %c0_i32 = arith.constant 0 : i32
    %c0_i32_0 = arith.constant 0 : i32
    %c0_i32_1 = arith.constant 0 : i32
    %c0_i32_2 = arith.constant 0 : i32
    return %arg0, %c0_i32, %c0_i32_0, %c0_i32_1 : i32, i32, i32, i32
  }
  func.func @transform_1(%arg0: i32) -> (i32, i32, i32) {
    %c0_i32 = arith.constant 0 : i32
    %c0_i32_0 = arith.constant 0 : i32
    %c0_i32_1 = arith.constant 0 : i32
    %c0_i32_2 = arith.constant 0 : i32
    return %c0_i32, %c0_i32_0, %c0_i32_1 : i32, i32, i32
  }
  func.func @transform_2(%arg0: i32) -> (i32, i32) {
    %c0_i32 = arith.constant 0 : i32
    %c0_i32_0 = arith.constant 0 : i32
    %c0_i32_1 = arith.constant 0 : i32
    return %c0_i32, %c0_i32_0 : i32, i32
  }
  func.func @transform_3(%arg0: i32) -> (i32, i32) {
    %c0_i32 = arith.constant 0 : i32
    %c0_i32_0 = arith.constant 0 : i32
    %c0_i32_1 = arith.constant 0 : i32
    return %c0_i32, %c0_i32_0 : i32, i32
  }
  func.func @transform_4(%arg0: i32) -> (i32, i32, i32) {
    %c0_i32 = arith.constant 0 : i32
    %c0_i32_0 = arith.constant 0 : i32
    %c0_i32_1 = arith.constant 0 : i32
    %c0_i32_2 = arith.constant 0 : i32
    return %c0_i32, %c0_i32_0, %c0_i32_1 : i32, i32, i32
  }
  func.func @transform_5(%arg0: i32) -> (i32, i32) {
    %c0_i32 = arith.constant 0 : i32
    %c0_i32_0 = arith.constant 0 : i32
    %c0_i32_1 = arith.constant 0 : i32
    return %c0_i32, %c0_i32_0 : i32, i32
  }
  func.func @transform_6(%arg0: i32) -> (i32, i32) {
    %c0_i32 = arith.constant 0 : i32
    %c0_i32_0 = arith.constant 0 : i32
    %c0_i32_1 = arith.constant 0 : i32
    return %c0_i32, %c0_i32_0 : i32, i32
  }
  func.func @transform_7(%arg0: i32) -> (i32, i32, i32) {
    %c0_i32 = arith.constant 0 : i32
    %c0_i32_0 = arith.constant 0 : i32
    %c0_i32_1 = arith.constant 0 : i32
    %c0_i32_2 = arith.constant 0 : i32
    return %c0_i32, %c0_i32_0, %c0_i32_1 : i32, i32, i32
  }
  func.func @transform_8(%arg0: i32) -> (i32, i32) {
    %c0_i32 = arith.constant 0 : i32
    %c0_i32_0 = arith.constant 0 : i32
    %c0_i32_1 = arith.constant 0 : i32
    return %c0_i32, %c0_i32_0 : i32, i32
  }
  func.func @transform_9(%arg0: i32) -> (i32, i32) {
    %c0_i32 = arith.constant 0 : i32
    %c0_i32_0 = arith.constant 0 : i32
    %c0_i32_1 = arith.constant 0 : i32
    return %c0_i32, %c0_i32_0 : i32, i32
  }
  func.func @transform_10(%arg0: i32) -> (i32, i32) {
    %c0_i32 = arith.constant 0 : i32
    %c0_i32_0 = arith.constant 0 : i32
    %c0_i32_1 = arith.constant 0 : i32
    return %c0_i32, %c0_i32_0 : i32, i32
  }
  func.func @transform_11(%arg0: i32) -> (i32, i32, i32) {
    %c0_i32 = arith.constant 0 : i32
    %c0_i32_0 = arith.constant 0 : i32
    %c0_i32_1 = arith.constant 0 : i32
    %c0_i32_2 = arith.constant 0 : i32
    return %c0_i32, %c0_i32_0, %c0_i32_1 : i32, i32, i32
  }
  func.func @transform_12(%arg0: i32) -> (i32, i32) {
    %c0_i32 = arith.constant 0 : i32
    %c0_i32_0 = arith.constant 0 : i32
    %c0_i32_1 = arith.constant 0 : i32
    return %c0_i32, %c0_i32_0 : i32, i32
  }
  func.func @transform_13(%arg0: i32) -> (i32, i32) {
    %c0_i32 = arith.constant 0 : i32
    %c0_i32_0 = arith.constant 0 : i32
    %c0_i32_1 = arith.constant 0 : i32
    return %c0_i32, %c0_i32_0 : i32, i32
  }
  func.func @transform_14(%arg0: i32) -> (i32, i32, i32) {
    %c0_i32 = arith.constant 0 : i32
    %c0_i32_0 = arith.constant 0 : i32
    %c0_i32_1 = arith.constant 0 : i32
    %c0_i32_2 = arith.constant 0 : i32
    return %c0_i32, %c0_i32_0, %c0_i32_1 : i32, i32, i32
  }
  func.func @transform_15(%arg0: i32) -> (i32, i32, i32) {
    %c0_i32 = arith.constant 0 : i32
    %c0_i32_0 = arith.constant 0 : i32
    %c0_i32_1 = arith.constant 0 : i32
    return %arg0, %c0_i32, %c0_i32_0 : i32, i32, i32
  }
}

</mosaic_0001>

<bundles_post_ra>
// kernel: tile.34
= control target key start
LH: loop header
LB: loop body
LE: loop exit
PB: predicated region body
PF: predicated region fallthrough
CT: control target
= control target key end

     0   :  { %s22_s0 = inlined_call_operand.vmem [shape: f32[8], index: 0, kind: input, shape index: {}]   ;;  %s23_s1 = inlined_call_operand.vmem [shape: f32[8,8], index: 1, kind: output, shape index: {}]  }
   0x1   :  { %v4_v0 = vld [vmem:[%s22_s0] ss:$0 sm:$0xff] }
   0x2   :  { %5 = vst [vmem:[%s23_s1] sm:$0xff] %v4_v0 }

// kernel: tile.42
= control target key start
LH: loop header
LB: loop body
LE: loop exit
PB: predicated region body
PF: predicated region fallthrough
CT: control target
= control target key end

     0   :  { %s22_s0 = inlined_call_operand.vmem [shape: f32[16], index: 0, kind: input, shape index: {}]   ;;  %s23_s1 = inlined_call_operand.vmem [shape: f32[8,16], index: 1, kind: output, shape index: {}]  }
   0x1   :  { %v4_v0 = vld [vmem:[%s22_s0] ss:$0 sm:$0xff] }
   0x2   :  { %5 = vst [vmem:[%s23_s1] sm:$0xff] %v4_v0 }

// kernel: tile.43
= control target key start
LH: loop header
LB: loop body
LE: loop exit
PB: predicated region body
PF: predicated region fallthrough
CT: control target
= control target key end

     0   :  { %s69_s10 = smov 112   ;;  %s70_s11 = smov 80   ;;  %vm3_vm0 = vcmask 130048   ;;  %vm9_vm1 = vcmask 1048448   ;;  %vm15_vm2 = vcmask 917248   ;;  %vm21_vm3 = vcmask 786048   ;;  %s113_s0 = inlined_call_operand.vmem [shape: f32[8,16], index: 0, kind: input, shape index: {}]   ;;  %s114_s1 = inlined_call_operand.vmem [shape: f32[1,128], index: 1, kind: output, shape index: {}]  }
   0x1   :  { %v55_v0 = vld [vmem:[%s113_s0 + $0x7] sm:$0x1]   ;;  %v57_v1 = vld [vmem:[%s113_s0 + $0x5] sm:$0x1]   ;;  %v56_v2 = vld [vmem:[%s113_s0 + $0x6] sm:$0x1]  }
   0x2   :  { %7 = vrot.lane.b32.xlu0 %v55_v0, %s69_s10  ;;  %19 = vrot.lane.b32.xlu1 %v57_v1, %s70_s11  ;;  %v58_v3 = vld [vmem:[%s113_s0 + $0x4] sm:$0x1]   ;;  %v2_v4 = vld [vmem:[%s113_s0] sm:$0x1]   ;;  %s71_s18 = smov 96   ;;  %s72_s19 = smov 64  }
   0x3   :  { %4 = vst.msk [vmem:[#allocation0] sm:$0x1] %vm3_vm0, %v2_v4   ;;  %v59_v5 = vld [vmem:[%s113_s0 + $0x3] sm:$0x1]   ;;  %v60_v6 = vld [vmem:[%s113_s0 + $0x2] sm:$0x1]  }
   0x4   :  { %s73_s24 = smov 48   ;;  %s74_s25 = smov 32   ;;  %v61_v7 = vld [vmem:[%s113_s0 + $0x1] sm:$0x1]   ;;  %vm27_vm4 = vcmask 654848   ;;  %vm33_vm5 = vcmask 523648  }
   0x5   :  { %s75_s0 = smov 16   ;;  %vm39_vm6 = vcmask 392448   ;;  %vm45_vm7 = vcmask 261248  }
   0x6   :  { %13 = vrot.lane.b32.xlu0 %v56_v2, %s71_s18  ;;  %25 = vrot.lane.b32.xlu1 %v58_v3, %s72_s19 }
   0xa   :  { %31 = vrot.lane.b32.xlu0 %v59_v5, %s73_s24  ;;  %37 = vrot.lane.b32.xlu1 %v60_v6, %s74_s25 }
   0xe   :  { %43 = vrot.lane.b32.xlu0 %v61_v7, %s75_s0 }
  0x74   :  { %v8_v8 = vpop.permute.xlu0 %7   ;;  %v20_v9 = vpop.permute.xlu1 %19  }
  0x75   :  { %10 = vst.msk [vmem:[#allocation0] sm:$0x1] %vm9_vm1, %v8_v8  }
  0x78   :  { %v14_v10 = vpop.permute.xlu0 %13   ;;  %v26_v11 = vpop.permute.xlu1 %25  }
  0x79   :  { %16 = vst.msk [vmem:[#allocation0] sm:$0x1] %vm15_vm2, %v14_v10  }
  0x7a   :  { %22 = vst.msk [vmem:[#allocation0] sm:$0x1] %vm21_vm3, %v20_v9  }
  0x7b   :  { %28 = vst.msk [vmem:[#allocation0] sm:$0x1] %vm27_vm4, %v26_v11  }
  0x7c   :  { %v32_v12 = vpop.permute.xlu0 %31   ;;  %v38_v13 = vpop.permute.xlu1 %37  }
  0x7d   :  { %34 = vst.msk [vmem:[#allocation0] sm:$0x1] %vm33_vm5, %v32_v12  }
  0x7e   :  { %40 = vst.msk [vmem:[#allocation0] sm:$0x1] %vm39_vm6, %v38_v13  }
  0x80   :  { %v44_v14 = vpop.permute.xlu0 %43  }
  0x81   :  { %46 = vst.msk [vmem:[#allocation0] sm:$0x1] %vm45_vm7, %v44_v14  }
  0x88   :  { %v51_v15 = vld [vmem:[#allocation0] sm:$0x1] }
  0x89   :  { %54 = vst [vmem:[%s114_s1] sm:$0x1] %v51_v15 }

// kernel: tile.35
= control target key start
LH: loop header
LB: loop body
LE: loop exit
PB: predicated region body
PF: predicated region fallthrough
CT: control target
= control target key end

     0   :  { %s69_s10 = smov 56   ;;  %s70_s11 = smov 40   ;;  %vm3_vm0 = vcmask 64512   ;;  %vm9_vm1 = vcmask 523712   ;;  %vm15_vm2 = vcmask 458112   ;;  %vm21_vm3 = vcmask 392512   ;;  %s113_s0 = inlined_call_operand.vmem [shape: f32[8,8], index: 0, kind: input, shape index: {}]   ;;  %s114_s1 = inlined_call_operand.vmem [shape: f32[1,64], index: 1, kind: output, shape index: {}]  }
   0x1   :  { %v55_v0 = vld [vmem:[%s113_s0 + $0x7] sm:$0x1]   ;;  %v57_v1 = vld [vmem:[%s113_s0 + $0x5] sm:$0x1]   ;;  %v56_v2 = vld [vmem:[%s113_s0 + $0x6] sm:$0x1]  }
   0x2   :  { %7 = vrot.lane.b32.xlu0 %v55_v0, %s69_s10  ;;  %19 = vrot.lane.b32.xlu1 %v57_v1, %s70_s11  ;;  %v58_v3 = vld [vmem:[%s113_s0 + $0x4] sm:$0x1]   ;;  %v2_v4 = vld [vmem:[%s113_s0] sm:$0x1]   ;;  %s71_s18 = smov 48   ;;  %s72_s19 = smov 32  }
   0x3   :  { %4 = vst.msk [vmem:[#allocation0] sm:$0x1] %vm3_vm0, %v2_v4   ;;  %v59_v5 = vld [vmem:[%s113_s0 + $0x3] sm:$0x1]   ;;  %v60_v6 = vld [vmem:[%s113_s0 + $0x2] sm:$0x1]  }
   0x4   :  { %s73_s24 = smov 24   ;;  %s74_s25 = smov 16   ;;  %v61_v7 = vld [vmem:[%s113_s0 + $0x1] sm:$0x1]   ;;  %vm27_vm4 = vcmask 326912   ;;  %vm33_vm5 = vcmask 261312  }
   0x5   :  { %s75_s0 = smov 8   ;;  %vm39_vm6 = vcmask 195712   ;;  %vm45_vm7 = vcmask 130112  }
   0x6   :  { %13 = vrot.lane.b32.xlu0 %v56_v2, %s71_s18  ;;  %25 = vrot.lane.b32.xlu1 %v58_v3, %s72_s19 }
   0xa   :  { %31 = vrot.lane.b32.xlu0 %v59_v5, %s73_s24  ;;  %37 = vrot.lane.b32.xlu1 %v60_v6, %s74_s25 }
   0xe   :  { %43 = vrot.lane.b32.xlu0 %v61_v7, %s75_s0 }
  0x74   :  { %v8_v8 = vpop.permute.xlu0 %7   ;;  %v20_v9 = vpop.permute.xlu1 %19  }
  0x75   :  { %10 = vst.msk [vmem:[#allocation0] sm:$0x1] %vm9_vm1, %v8_v8  }
  0x78   :  { %v14_v10 = vpop.permute.xlu0 %13   ;;  %v26_v11 = vpop.permute.xlu1 %25  }
  0x79   :  { %16 = vst.msk [vmem:[#allocation0] sm:$0x1] %vm15_vm2, %v14_v10  }
  0x7a   :  { %22 = vst.msk [vmem:[#allocation0] sm:$0x1] %vm21_vm3, %v20_v9  }
  0x7b   :  { %28 = vst.msk [vmem:[#allocation0] sm:$0x1] %vm27_vm4, %v26_v11  }
  0x7c   :  { %v32_v12 = vpop.permute.xlu0 %31   ;;  %v38_v13 = vpop.permute.xlu1 %37  }
  0x7d   :  { %34 = vst.msk [vmem:[#allocation0] sm:$0x1] %vm33_vm5, %v32_v12  }
  0x7e   :  { %40 = vst.msk [vmem:[#allocation0] sm:$0x1] %vm39_vm6, %v38_v13  }
  0x80   :  { %v44_v14 = vpop.permute.xlu0 %43  }
  0x81   :  { %46 = vst.msk [vmem:[#allocation0] sm:$0x1] %vm45_vm7, %v44_v14  }
  0x88   :  { %v51_v15 = vld [vmem:[#allocation0] sm:$0x1] }
  0x89   :  { %54 = vst [vmem:[%s114_s1] sm:$0x1] %v51_v15 }

// kernel: _lambda_.1
= control target key start
LH: loop header
LB: loop body
LE: loop exit
PB: predicated region body
PF: predicated region fallthrough
CT: control target
= control target key end

     0   :  { %s3607_s18 = smov 0   ;;  %s4155_s0 = inlined_call_operand.vmem [shape: f32[2,4,8,64], index: 0, kind: input, shape index: {}]   ;;  %s4156_s1 = inlined_call_operand.vmem [shape: f32[2,8,8], index: 1, kind: input, shape index: {}]   ;;  %s4157_s2 = inlined_call_operand.vmem [shape: f32[1,64], index: 2, kind: input, shape index: {}]   ;;  %s4158_s3 = inlined_call_operand.vmem [shape: f32[1,64], index: 3, kind: input, shape index: {}]   ;;  %s4159_s4 = inlined_call_operand.vmem [shape: bf16[6,64,128], index: 4, kind: input, shape index: {}]   ;;  %s4160_s5 = inlined_call_operand.vmem [shape: f32[1,128], index: 5, kind: input, shape index: {}]   ;;  %s4161_s6 = inlined_call_operand.vmem [shape: f32[1,128], index: 6, kind: input, shape index: {}]   ;;  %s4162_s7 = inlined_call_operand.vmem [shape: bf16[3,128,128], index: 7, kind: input, shape index: {}]   ;;  %s4163_s8 = inlined_call_operand.vmem [shape: bf16[64,128], index: 8, kind: input, shape index: {}]   ;;  %s4164_s9 = inlined_call_operand.vmem [shape: f32[1,128], index: 9, kind: input, shape index: {}]   ;;  %s4165_s10 = inlined_call_operand.vmem [shape: f32[1,128], index: 10, kind: input, shape index: {}]   ;;  %s4166_s11 = inlined_call_operand.vmem [shape: bf16[3,128,128], index: 11, kind: input, shape index: {}]   ;;  %s4167_s12 = inlined_call_operand.vmem [shape: f32[1,128], index: 12, kind: input, shape index: {}]   ;;  %s4168_s13 = inlined_call_operand.vmem [shape: f32[1,128], index: 13, kind: input, shape index: {}]   ;;  %s4169_s14 = inlined_call_operand.vmem [shape: bf16[3,128,128], index: 14, kind: input, shape index: {}]   ;;  %s4170_s15 = inlined_call_operand.vmem [shape: f32[2,8,128], index: 15, kind: output, shape index: {}]  }
   0x1 LB: > { %s2696_s19 = sadd.s32 4294967295, %s3523_s18   ;;  %p2700_p0 = scmp.ge.s32.totalorder %s3523_s18, 1  ;;  %s3523_s18 = sphi %s3607_s18, %s25_s18  }
   0x2   : > { %p437_p1 = scmp.lt.s32.totalorder %s3523_s18, 3 }
   0x4   : > { %p438_p2 = pnand %p2700_p0, %p437_p1 }
   0x5   : > { %p484_p3 = scmp.lt.s32.totalorder (!%p438_p2), %s2696_s19, 1 }
   0x6   : > { %441 = sbr.rel (%p438_p2) target bundleno = 1671 (0x687), region = 80 }
   0xb   : > { %v3525_v0 = vmov 0.0   ;;  %s4172_s19 = smov (!%p484_p3, %s2696_s19), 1  ;;  %v2705_v1 = vld [vmem:[%s4157_s2] ss:$0 sm:$0xff]  ;;  %vm3526_vm0 = vmmov 0   ;;  %vm530_vm1 = vcmask 64512  }
   0xc   : > { %3107 = vmatprep.subr.mxu1 %v3525_v0  ;;  %3102 = vmatprep.subr.mxu0 %v3525_v0  ;;  %s2969_s22 = sshll.u32 %s4172_s19, 5  ;;  %v2706_v2 = vld [vmem:[%s4158_s3] ss:$0 sm:$0xff]  ;;  %v3416_v18 = vld [vmem:[%s4159_s4 + $0x38] sm:$0xff]   ;;  %v3417_v19 = vld [vmem:[%s4159_s4 + $0x30] sm:$0xff]   ;;  %vm717_vm2 = vcmask 523264  }
   0xd   : > { %3109 = vmatprep.mubr.msk.f32.mxu1 %vm3526_vm0, %v3525_v0  ;;  %3104 = vmatprep.mubr.msk.f32.mxu0 %vm3526_vm0, %v3525_v0  ;;  %s488_s25 = scalar_lea.vmem %s4155_s0, %s2969_s22  ;;  %v3638_v16 = vld [vmem:[%s4156_s1] sm:$0xff]  ;;  %v3418_v20 = vld [vmem:[%s4159_s4 + $0x28] sm:$0xff]   ;;  %v3424_v22 = vld [vmem:[%s4159_s4 + $0x78] sm:$0xff]  }
   0xe   : > { %v499_v3 = vld [vmem:[%s488_s25] sm:$0xff]  ;;  %v2707_v4 = vld [vmem:[%s488_s25 + $0x8] sm:$0xff]  ;;  %v2709_v5 = vld [vmem:[%s488_s25 + $0x18] sm:$0xff] }
   0xf   : > { %v506_v6 = vmul.f32 %v2705_v1, %v499_v3  ;;  %v517_v7 = vmul.f32 %v2707_v4, %v2705_v1  ;;  %v527_v8 = vmul.f32 %v2709_v5, %v2705_v1  ;;  %v2708_v9 = vld [vmem:[%s488_s25 + $0x10] sm:$0xff]  ;;  %v3419_v21 = vld [vmem:[%s4159_s4 + $0x20] sm:$0xff]   ;;  %v3428_v24 = vld [vmem:[%s4159_s4 + $0x68] sm:$0xff]   ;;  %s2703_s25 = sshll.u32 %s4172_s19, 3 }
  0x10   : > { %v522_v10 = vmul.f32 %v2708_v9, %v2705_v1  ;;  %v3426_v23 = vld [vmem:[%s4159_s4 + $0x70] sm:$0xff]   ;;  %v3430_v26 = vld [vmem:[%s4159_s4 + $0x60] sm:$0xff]   ;;  %v3432_v28 = vld [vmem:[%s4159_s4 + $0xb8] sm:$0xff]   ;;  %s492_s28 = scalar_lea.vmem %s4170_s15, %s2703_s25 }
  0x11   : > { %v3633_v11 = vadd.f32 %v2706_v2, %v506_v6  ;;  %v518_v12 = vadd.f32 %v2706_v2, %v517_v7  ;;  %v528_v13 = vadd.f32 %v2706_v2, %v527_v8  ;;  %v3434_v29 = vld [vmem:[%s4159_s4 + $0xb0] sm:$0xff]   ;;  %v3436_v30 = vld [vmem:[%s4159_s4 + $0xa8] sm:$0xff]   ;;  %v3438_v31 = vld [vmem:[%s4159_s4 + $0xa0] sm:$0xff]  }
  0x12   : > { %v523_v14 = vadd.f32 %v2706_v2, %v522_v10  ;;  %v3420_v34 = vld [vmem:[%s4159_s4 + $0x18] sm:$0xff]   ;;  %v3421_v39 = vld [vmem:[%s4159_s4 + $0x10] sm:$0xff]   ;;  %v3422_v40 = vld [vmem:[%s4159_s4 + $0x8] sm:$0xff]  }
  0x13   : > { %v529_v15 = vmax.f32 %v528_v13, 0.0  ;;  %v519_v25 = vmax.f32 %v518_v12, 0.0  ;;  %v3423_v41 = vld [vmem:[%s4159_s4] sm:$0xff]   ;;  %v3425_v43 = vld [vmem:[%s4159_s4 + $0x58] sm:$0xff]   ;;  %v3427_v44 = vld [vmem:[%s4159_s4 + $0x50] sm:$0xff]   ;;  %v514_v46 = vmax.f32 %v3633_v11, 0.0 }
  0x14   : > { %v3640_v17 = vmax.f32 %v523_v14, 0.0  ;;  %v3429_v45 = vld [vmem:[%s4159_s4 + $0x48] sm:$0xff]   ;;  %v3431_v47 = vld [vmem:[%s4159_s4 + $0x40] sm:$0xff]   ;;  %v3433_v49 = vld [vmem:[%s4159_s4 + $0x98] sm:$0xff]  }
  0x15   : > { %3108 = vmatpush3.msra.mxu1 %v529_v15  ;;  %v915_v27 = vpack.c.bf16 %v519_v25, %v519_v25  ;;  %v1071_v32 = vpack.c.bf16 %v529_v15, %v529_v15  ;;  %v837_v48 = vpack.c.bf16 %v514_v46, %v514_v46  ;;  %v3435_v50 = vld [vmem:[%s4159_s4 + $0x90] sm:$0xff]   ;;  %v3437_v51 = vld [vmem:[%s4159_s4 + $0x88] sm:$0xff]   ;;  %v3439_v52 = vld [vmem:[%s4159_s4 + $0x80] sm:$0xff]  }
  0x16   : > { %3110 = vmatmul.mubr.msk.f32.vlgmr.msra.gmra.mxu1 %vm530_vm1, %v3638_v16  ;;  %3103 = vmatpush3.msra.mxu0 %v3640_v17  ;;  %v993_v53 = vpack.c.bf16 %v3640_v17, %v3640_v17  ;;  %v3448_v62 = vld [vmem:[%s4163_s8 + $0x18] sm:$0xff]   ;;  %v3449_v63 = vld [vmem:[%s4163_s8 + $0x10] sm:$0xff]   ;;  %v3450_v1 = vld [vmem:[%s4163_s8 + $0x8] sm:$0xff]  }
  0x17   : > { %3105 = vmatmul.mubr.msk.f32.vlgmr.msra.gmra.mxu0 %vm530_vm1, %v3638_v16  ;;  %3112 = vmatprep.subr.bf16.mxu0 %v3525_v0  ;;  %v3451_v2 = vld [vmem:[%s4163_s8] sm:$0xff]   ;;  %v3452_v3 = vld [vmem:[%s4162_s7 + $0x38] sm:$0xff]   ;;  %v3453_v4 = vld [vmem:[%s4162_s7 + $0x30] sm:$0xff]  }
  0x18   : > { %3113 = vmatpush3.bf16.msra.mxu0 %v3416_v18  ;;  %3120 = vmatprep.mubr.msk.bf16.mxu0 %vm3526_vm0, %v3525_v0  ;;  %v3455_v5 = vld [vmem:[%s4162_s7 + $0x28] sm:$0xff]   ;;  %v3457_v6 = vld [vmem:[%s4162_s7 + $0x20] sm:$0xff]   ;;  %v3459_v7 = vld [vmem:[%s4162_s7 + $0x18] sm:$0xff]  }
  0x19   : > { %3114 = vmatprep.subr.bf16.mxu0 %v3525_v0  ;;  %3148 = vmatprep.subr.bf16.mxu1 %v3525_v0  ;;  %v3461_v10 = vld [vmem:[%s4162_s7 + $0x10] sm:$0xff]   ;;  %v3463_v13 = vld [vmem:[%s4162_s7 + $0x8] sm:$0xff]   ;;  %v3454_v46 = vld [vmem:[%s4162_s7 + $0xb8] sm:$0xff]  }
  0x1a   : > { %3156 = vmatprep.mubr.msk.bf16.mxu1 %vm3526_vm0, %v3525_v0  ;;  %3149 = vmatpush3.bf16.msra.mxu1 %v3424_v22 }
  0x1b   : > { %3150 = vmatprep.subr.bf16.mxu1 %v3525_v0 }
  0x1c   : > { %3115 = vmatpush3.bf16.msra.mxu0 %v3417_v19 }
  0x1d   : > { %3116 = vmatprep.subr.bf16.mxu0 %v3525_v0 }
  0x1e   : > { %3151 = vmatpush3.bf16.msra.mxu1 %v3426_v23 }
  0x1f   : > { %3152 = vmatprep.subr.bf16.mxu1 %v3525_v0 }
  0x20   : > { %3117 = vmatpush3.bf16.msra.mxu0 %v3418_v20 }
  0x21   : > { %3118 = vmatprep.subr.bf16.mxu0 %v3525_v0 }
  0x22   : > { %3153 = vmatpush3.bf16.msra.mxu1 %v3428_v24 }
  0x23   : > { %3154 = vmatprep.subr.bf16.mxu1 %v3525_v0 }
  0x24   : > { %3119 = vmatpush3.bf16.msra.mxu0 %v3419_v21 }
  0x25   : > { %3124 = vmatprep.subr.bf16.mxu0 %v3525_v0 }
  0x26   : > { %3155 = vmatpush3.bf16.msra.mxu1 %v3430_v26 }
  0x27   : > { %3172 = vmatprep.subr.bf16.mxu1 %v3525_v0 }
  0x29   : > { %3157 = vmatmul.mubr.msk.bf16.vlgmr.msra.gmra.mxu1 %vm717_vm2, %v915_v27 }
  0x2a   : > { %3173 = vmatpush3.bf16.msra.mxu1 %v3432_v28  ;;  %3180 = vmatprep.mubr.msk.bf16.mxu1 %vm3526_vm0, %v3525_v0  ;;  %v2787_v28 = vld [vmem:[%s4160_s5] ss:$0 sm:$0xff] }
  0x2b   : > { %3174 = vmatprep.subr.bf16.mxu1 %v3525_v0 }
  0x2e   : > { %3175 = vmatpush3.bf16.msra.mxu1 %v3434_v29 }
  0x2f   : > { %3176 = vmatprep.subr.bf16.mxu1 %v3525_v0 }
  0x32   : > { %3177 = vmatpush3.bf16.msra.mxu1 %v3436_v30 }
  0x33   : > { %3178 = vmatprep.subr.bf16.mxu1 %v3525_v0 }
  0x36   : > { %3179 = vmatpush3.bf16.msra.mxu1 %v3438_v31  ;;  %v2788_v31 = vld [vmem:[%s4161_s6] ss:$0 sm:$0xff] }
  0x37   : > { %3196 = vmatprep.subr.mxu1 %v3525_v0 }
  0x39   : > { %3181 = vmatmul.mubr.msk.bf16.vlgmr.msra.gmra.mxu1 %vm717_vm2, %v1071_v32 }
  0x3a   : > { %3198 = vmatprep.mubr.msk.f32.mxu1 %vm3526_vm0, %v3525_v0 }
  0xd6   : > { %v670_v33 = vpop.f32.mrf.mxu1 }
  0xd7   : > { %v692_v35 = vpack.c.bf16 %v670_v33, %v670_v33  ;;  %v600_v36 = vpop.f32.mrf.mxu0 }
  0xd8   : > { %v3111_v37 = vpop.f32.mrf.mxu1  ;;  %v682_v42 = vpack.c.bf16 %v600_v36, %v600_v36 }
  0xd9   : > { %3121 = vmatmul.mubr.msk.bf16.vlgmr.msra.gmra.mxu0 %vm717_vm2, %v692_v35  ;;  %v3106_v38 = vpop.f32.mrf.mxu0  ;;  %v3831_v37 = vld [vmem:[%s4156_s1 + $0x8] sm:$0xff] }
  0xda   : > { %3125 = vmatpush3.bf16.msra.mxu0 %v3420_v34  ;;  %3132 = vmatprep.mubr.msk.bf16.mxu0 %vm3526_vm0, %v3525_v0  ;;  %v3440_v38 = vld [vmem:[%s4162_s7 + $0x78] sm:$0xff]  }
  0xdb   : > { %3126 = vmatprep.subr.bf16.mxu0 %v3525_v0 }
  0xde   : > { %3127 = vmatpush3.bf16.msra.mxu0 %v3421_v39  ;;  %v3441_v39 = vld [vmem:[%s4162_s7 + $0x70] sm:$0xff]  }
  0xdf   : > { %3128 = vmatprep.subr.bf16.mxu0 %v3525_v0 }
  0xe2   : > { %3129 = vmatpush3.bf16.msra.mxu0 %v3422_v40  ;;  %v3442_v40 = vld [vmem:[%s4162_s7 + $0x68] sm:$0xff]  }
  0xe3   : > { %3130 = vmatprep.subr.bf16.mxu0 %v3525_v0 }
  0xe6   : > { %3131 = vmatpush3.bf16.msra.mxu0 %v3423_v41  ;;  %v3443_v41 = vld [vmem:[%s4162_s7 + $0x60] sm:$0xff]  }
  0xe7   : > { %3136 = vmatprep.subr.bf16.mxu0 %v3525_v0 }
  0xe9   : > { %3133 = vmatmul.mubr.msk.bf16.vlgmr.msra.gmra.mxu0 %vm717_vm2, %v682_v42  ;;  %v977_v54 = vpop.f32.mrf.mxu1  ;;  %v3444_v42 = vld [vmem:[%s4162_s7 + $0x58] sm:$0xff]  }
  0xea   : > { %3137 = vmatpush3.bf16.msra.mxu0 %v3425_v43  ;;  %3144 = vmatprep.mubr.msk.bf16.mxu0 %vm3526_vm0, %v3525_v0  ;;  %v3445_v43 = vld [vmem:[%s4162_s7 + $0x50] sm:$0xff]  }
  0xeb   : > { %3138 = vmatprep.subr.bf16.mxu0 %v3525_v0  ;;  %v3158_v55 = vpop.f32.mrf.mxu1 }
  0xec   : > { %v3467_v55 = vld [vmem:[%s4162_s7 + $0x80] sm:$0xff]  }
  0xed   : > { %v980_v56 = vpop.f32.mrf.mxu1 }
  0xee   : > { %3139 = vmatpush3.bf16.msra.mxu0 %v3427_v44  ;;  %v3446_v44 = vld [vmem:[%s4162_s7 + $0x48] sm:$0xff]  }
  0xef   : > { %3140 = vmatprep.subr.bf16.mxu0 %v3525_v0  ;;  %v3159_v57 = vpop.f32.mrf.mxu1 }
  0xf2   : > { %3141 = vmatpush3.bf16.msra.mxu0 %v3429_v45  ;;  %v3447_v45 = vld [vmem:[%s4162_s7 + $0x40] sm:$0xff]  }
  0xf3   : > { %3142 = vmatprep.subr.bf16.mxu0 %v3525_v0 }
  0xf6   : > { %3143 = vmatpush3.bf16.msra.mxu0 %v3431_v47 }
  0xf7   : > { %3160 = vmatprep.subr.bf16.mxu0 %v3525_v0 }
  0xf9   : > { %3145 = vmatmul.mubr.msk.bf16.vlgmr.msra.gmra.mxu0 %vm717_vm2, %v837_v48  ;;  %v1133_v58 = vpop.f32.mrf.mxu1 }
  0xfa   : > { %3161 = vmatpush3.bf16.msra.mxu0 %v3433_v49  ;;  %3168 = vmatprep.mubr.msk.bf16.mxu0 %vm3526_vm0, %v3525_v0  ;;  %v3458_v49 = vld [vmem:[%s4162_s7 + $0xa8] sm:$0xff]  }
  0xfb   : > { %3162 = vmatprep.subr.bf16.mxu0 %v3525_v0  ;;  %v3182_v59 = vpop.f32.mrf.mxu1 }
  0xfd   : > { %v1136_v60 = vpop.f32.mrf.mxu1 }
  0xfe   : > { %3163 = vmatpush3.bf16.msra.mxu0 %v3435_v50  ;;  %v3460_v50 = vld [vmem:[%s4162_s7 + $0xa0] sm:$0xff]  }
  0xff   : > { %3164 = vmatprep.subr.bf16.mxu0 %v3525_v0  ;;  %v3183_v61 = vpop.f32.mrf.mxu1 }
 0x102   : > { %3165 = vmatpush3.bf16.msra.mxu0 %v3437_v51  ;;  %v3462_v51 = vld [vmem:[%s4162_s7 + $0x98] sm:$0xff]  }
 0x103   : > { %3166 = vmatprep.subr.bf16.mxu0 %v3525_v0 }
 0x106   : > { %3167 = vmatpush3.bf16.msra.mxu0 %v3439_v52  ;;  %v3464_v52 = vld [vmem:[%s4162_s7 + $0x90] sm:$0xff]  }
 0x107   : > { %3184 = vmatprep.subr.bf16.mxu0 %v3525_v0 }
 0x109   : > { %3169 = vmatmul.mubr.msk.bf16.vlgmr.msra.gmra.mxu0 %vm717_vm2, %v993_v53  ;;  %v3465_v53 = vld [vmem:[%s4162_s7] sm:$0xff]  }
 0x10a   : > { %3192 = vmatprep.mubr.msk.bf16.mxu0 %vm3526_vm0, %v3525_v0  ;;  %3185 = vmatpush3.bf16.msra.mxu0 %v3448_v62 }
 0x10b   : > { %3186 = vmatprep.subr.bf16.mxu0 %v3525_v0 }
 0x10e   : > { %3187 = vmatpush3.bf16.msra.mxu0 %v3449_v63 }
 0x10f   : > { %3188 = vmatprep.subr.bf16.mxu0 %v3525_v0 }
 0x112   : > { %3189 = vmatpush3.bf16.msra.mxu0 %v3450_v1 }
 0x113   : > { %3190 = vmatprep.subr.bf16.mxu0 %v3525_v0 }
 0x116   : > { %3191 = vmatpush3.bf16.msra.mxu0 %v3451_v2 }
 0x117   : > { %3226 = vmatprep.subr.bf16.mxu0 %v3525_v0 }
 0x119   : > { %3193 = vmatmul.mubr.msk.bf16.vlgmr.msra.gmra.mxu0 %vm717_vm2, %v837_v48  ;;  %v3456_v48 = vld [vmem:[%s4162_s7 + $0xb0] sm:$0xff]  }
 0x11a   : > { %3227 = vmatpush3.bf16.msra.mxu0 %v3452_v3  ;;  %3242 = vmatprep.mubr.msk.bf16.mxu0 %vm3526_vm0, %v3525_v0 }
 0x11b   : > { %3228 = vmatprep.subr.bf16.mxu0 %v3525_v0 }
 0x11e   : > { %3229 = vmatpush3.bf16.msra.mxu0 %v3453_v4 }
 0x11f   : > { %3230 = vmatprep.subr.bf16.mxu0 %v3525_v0 }
 0x122   : > { %3231 = vmatpush3.bf16.msra.mxu0 %v3455_v5 }
 0x123   : > { %3232 = vmatprep.subr.bf16.mxu0 %v3525_v0 }
 0x126   : > { %3233 = vmatpush3.bf16.msra.mxu0 %v3457_v6 }
 0x127   : > { %3234 = vmatprep.subr.bf16.mxu0 %v3525_v0 }
 0x12a   : > { %3235 = vmatpush3.bf16.msra.mxu0 %v3459_v7  ;;  %v3476_v7 = vld [vmem:[%s4166_s11 + $0x38] sm:$0xff]  }
 0x12b   : > { %3236 = vmatprep.subr.bf16.mxu0 %v3525_v0 }
 0x12e   : > { %3237 = vmatpush3.bf16.msra.mxu0 %v3461_v10  ;;  %v3481_v10 = vld [vmem:[%s4166_s11 + $0x20] sm:$0xff]  }
 0x12f   : > { %3238 = vmatprep.subr.bf16.mxu0 %v3525_v0 }
 0x132   : > { %3239 = vmatpush3.bf16.msra.mxu0 %v3463_v13  ;;  %v3487_v13 = vld [vmem:[%s4166_s11 + $0x8] sm:$0xff]  }
 0x133   : > { %3240 = vmatprep.subr.bf16.mxu0 %v3525_v0 }
 0x136   : > { %3241 = vmatpush3.bf16.msra.mxu0 %v3465_v53 }
 0x137   : > { %3266 = vmatprep.subr.mxu0 %v3525_v0 }
 0x199   : > { %v755_v8 = vpop.f32.mrf.mxu0 }
 0x19b   : > { %v3122_v9 = vpop.f32.mrf.mxu0 }
 0x19c   : > { %v3479_v9 = vld [vmem:[%s4166_s11 + $0x28] sm:$0xff]  }
 0x19d   : > { %v758_v11 = vpop.f32.mrf.mxu0 }
 0x19e   : > { %v3483_v11 = vld [vmem:[%s4166_s11 + $0x18] sm:$0xff]  }
 0x19f   : > { %v3123_v12 = vpop.f32.mrf.mxu0 }
 0x1a0   : > { %v3485_v12 = vld [vmem:[%s4166_s11 + $0x10] sm:$0xff]  }
 0x1a9   : > { %v822_v14 = vpop.f32.mrf.mxu0 }
 0x1aa   : > { %v823_v23 = vadd.f32 %v822_v14, %v755_v8  ;;  %v3477_v8 = vld [vmem:[%s4166_s11 + $0x30] sm:$0xff]  }
 0x1ab   : > { %v3134_v15 = vpop.f32.mrf.mxu0 }
 0x1ad   : > { %v825_v17 = vpop.f32.mrf.mxu0 }
 0x1af   : > { %v3135_v18 = vpop.f32.mrf.mxu0 }
 0x1b9   : > { %v899_v19 = vpop.f32.mrf.mxu0 }
 0x1ba   : > { %v905_v24 = vadd.f32 %v899_v19, %v823_v23 }
 0x1bb   : > { %v3146_v20 = vpop.f32.mrf.mxu0 }
 0x1bc   : > { %v983_v25 = vadd.f32 %v977_v54, %v905_v24  ;;  %v3466_v54 = vld [vmem:[%s4162_s7 + $0x88] sm:$0xff]  }
 0x1bd   : > { %v902_v21 = vpop.f32.mrf.mxu0 }
 0x1be   : > { %v2847_v21 = vld [vmem:[%s4164_s9] ss:$0 sm:$0xff] }
 0x1bf   : > { %v3147_v22 = vpop.f32.mrf.mxu0 }
 0x1c9   : > { %v1055_v26 = vpop.f32.mrf.mxu0 }
 0x1ca   : > { %v1061_v27 = vadd.f32 %v1055_v26, %v983_v25  ;;  %v2848_v25 = vld [vmem:[%s4165_s10] ss:$0 sm:$0xff] }
 0x1cb   : > { %v3170_v29 = vpop.f32.mrf.mxu0 }
 0x1cc   : > { %v1139_v30 = vadd.f32 %v1133_v58, %v1061_v27 }
 0x1cd   : > { %v1058_v32 = vpop.f32.mrf.mxu0 }
 0x1ce   : > { %v1219_v33 = vmul.f32 %v2787_v28, %v1139_v30  ;;  %v3470_v32 = vld [vmem:[%s4166_s11 + $0x68] sm:$0xff]  }
 0x1cf   : > { %v3171_v34 = vpop.f32.mrf.mxu0 }
 0x1d0   : > { %v1227_v35 = vadd.f32 %v2788_v31, %v1219_v33  ;;  %v3468_v31 = vld [vmem:[%s4166_s11 + $0x78] sm:$0xff]   ;;  %v3471_v33 = vld [vmem:[%s4166_s11 + $0x60] sm:$0xff]  }
 0x1d1   : > { %v3472_v34 = vld [vmem:[%s4166_s11 + $0x58] sm:$0xff]  }
 0x1d2   : > { %v1228_v36 = vmax.f32 %v1227_v35, 0.0  ;;  %v3473_v35 = vld [vmem:[%s4166_s11 + $0x50] sm:$0xff]  }
 0x1d4   : > { %3197 = vmatpush3.msra.mxu1 %v1228_v36  ;;  %v1406_v47 = vpack.c.bf16 %v1228_v36, %v1228_v36 }
 0x1d5   : > { %3199 = vmatmul.mubr.msk.f32.vlgmr.msra.gmra.mxu1 %vm530_vm1, %v3638_v16  ;;  %3201 = vmatprep.subr.mxu1 %v3525_v0 }
 0x1d6   : > { %3202 = vmatpush3.msra.mxu1 %v1228_v36  ;;  %3203 = vmatprep.mubr.msk.f32.mxu1 %vm3526_vm0, %v3525_v0  ;;  %v3474_v36 = vld [vmem:[%s4166_s11 + $0x48] sm:$0xff]  }
 0x1d7   : > { %3206 = vmatprep.subr.bf16.mxu1 %v3525_v0 }
 0x1d9   : > { %3204 = vmatmul.mubr.msk.f32.vlgmr.msra.gmra.mxu1 %vm530_vm1, %v3831_v37  ;;  %v1206_v56 = vpop.f32.mrf.mxu0 }
 0x1da   : > { %3207 = vmatpush3.bf16.msra.mxu1 %v3440_v38  ;;  %3222 = vmatprep.mubr.msk.bf16.mxu1 %vm3526_vm0, %v3525_v0  ;;  %v3475_v38 = vld [vmem:[%s4166_s11 + $0x40] sm:$0xff]  }
 0x1db   : > { %3208 = vmatprep.subr.bf16.mxu1 %v3525_v0  ;;  %v3194_v57 = vpop.f32.mrf.mxu0 }
 0x1dd   : > { %v1209_v58 = vpop.f32.mrf.mxu0 }
 0x1de   : > { %3209 = vmatpush3.bf16.msra.mxu1 %v3441_v39  ;;  %v3478_v39 = vld [vmem:[%s4166_s11 + $0xb8] sm:$0xff]  }
 0x1df   : > { %3210 = vmatprep.subr.bf16.mxu1 %v3525_v0  ;;  %v3195_v59 = vpop.f32.mrf.mxu0 }
 0x1e0   : > { %v3500_v59 = vld [vmem:[%s4169_s14 + $0x38] sm:$0xff]  }
 0x1e2   : > { %3211 = vmatpush3.bf16.msra.mxu1 %v3442_v40 }
 0x1e3   : > { %3212 = vmatprep.subr.bf16.mxu1 %v3525_v0 }
 0x1e6   : > { %3213 = vmatpush3.bf16.msra.mxu1 %v3443_v41  ;;  %v3480_v41 = vld [vmem:[%s4166_s11 + $0xb0] sm:$0xff]  }
 0x1e7   : > { %3214 = vmatprep.subr.bf16.mxu1 %v3525_v0 }
 0x1ea   : > { %3215 = vmatpush3.bf16.msra.mxu1 %v3444_v42  ;;  %v3482_v42 = vld [vmem:[%s4166_s11 + $0xa8] sm:$0xff]  }
 0x1eb   : > { %3216 = vmatprep.subr.bf16.mxu1 %v3525_v0 }
 0x1ee   : > { %3217 = vmatpush3.bf16.msra.mxu1 %v3445_v43  ;;  %v3484_v43 = vld [vmem:[%s4166_s11 + $0xa0] sm:$0xff]  }
 0x1ef   : > { %3218 = vmatprep.subr.bf16.mxu1 %v3525_v0 }
 0x1f2   : > { %3219 = vmatpush3.bf16.msra.mxu1 %v3446_v44  ;;  %v3486_v44 = vld [vmem:[%s4166_s11 + $0x98] sm:$0xff]  }
 0x1f3   : > { %3220 = vmatprep.subr.bf16.mxu1 %v3525_v0 }
 0x1f6   : > { %3221 = vmatpush3.bf16.msra.mxu1 %v3447_v45  ;;  %v3488_v45 = vld [vmem:[%s4166_s11 + $0x90] sm:$0xff]  }
 0x1f7   : > { %3246 = vmatprep.subr.bf16.mxu1 %v3525_v0 }
 0x1f9   : > { %3223 = vmatmul.mubr.bf16.vlgmr.msra.gmra.mxu1 %v1406_v47  ;;  %v3490_v47 = vld [vmem:[%s4166_s11 + $0x88] sm:$0xff]  }
 0x1fa   : > { %3247 = vmatpush3.bf16.msra.mxu1 %v3454_v46  ;;  %3262 = vmatprep.mubr.msk.bf16.mxu1 %vm3526_vm0, %v3525_v0  ;;  %v3489_v46 = vld [vmem:[%s4166_s11] sm:$0xff]  }
 0x1fb   : > { %3248 = vmatprep.subr.bf16.mxu1 %v3525_v0 }
 0x1fe   : > { %3249 = vmatpush3.bf16.msra.mxu1 %v3456_v48  ;;  %v3491_v48 = vld [vmem:[%s4166_s11 + $0x80] sm:$0xff]  }
 0x1ff   : > { %3250 = vmatprep.subr.bf16.mxu1 %v3525_v0 }
 0x202   : > { %3251 = vmatpush3.bf16.msra.mxu1 %v3458_v49 }
 0x203   : > { %3252 = vmatprep.subr.bf16.mxu1 %v3525_v0 }
 0x206   : > { %3253 = vmatpush3.bf16.msra.mxu1 %v3460_v50 }
 0x207   : > { %3254 = vmatprep.subr.bf16.mxu1 %v3525_v0 }
 0x20a   : > { %3255 = vmatpush3.bf16.msra.mxu1 %v3462_v51 }
 0x20b   : > { %3256 = vmatprep.subr.bf16.mxu1 %v3525_v0 }
 0x20e   : > { %3257 = vmatpush3.bf16.msra.mxu1 %v3464_v52 }
 0x20f   : > { %3258 = vmatprep.subr.bf16.mxu1 %v3525_v0 }
 0x212   : > { %3259 = vmatpush3.bf16.msra.mxu1 %v3466_v54 }
 0x213   : > { %3260 = vmatprep.subr.bf16.mxu1 %v3525_v0 }
 0x216   : > { %3261 = vmatpush3.bf16.msra.mxu1 %v3467_v55 }
 0x217   : > { %3296 = vmatprep.subr.bf16.mxu1 %v3525_v0 }
 0x295   : > { %v1295_v60 = vpop.f32.mrf.mxu1 }
 0x296   : > { %v1388_v61 = vpack.c.bf16 %v1295_v60, %v1295_v60  ;;  %v3501_v60 = vld [vmem:[%s4169_s14 + $0x30] sm:$0xff]  }
 0x297   : > { %v3200_v62 = vpop.f32.mrf.mxu1 }
 0x298   : > { %3243 = vmatmul.mubr.bf16.vlgmr.msra.gmra.mxu0 %v1388_v61  ;;  %v3503_v61 = vld [vmem:[%s4169_s14 + $0x28] sm:$0xff]   ;;  %v3505_v62 = vld [vmem:[%s4169_s14 + $0x20] sm:$0xff]  }
 0x299   : > { %v1368_v63 = vpop.f32.mrf.mxu1  ;;  %3268 = vmatprep.mubr.msk.f32.mxu0 %vm3526_vm0, %v3525_v0 }
 0x29a   : > { %v1600_v1 = vpack.c.bf16 %v1368_v63, %v1368_v63  ;;  %v3507_v63 = vld [vmem:[%s4169_s14 + $0x18] sm:$0xff]  }
 0x29b   : > { %v3205_v2 = vpop.f32.mrf.mxu1 }
 0x29c   : > { %3263 = vmatmul.mubr.bf16.vlgmr.msra.gmra.mxu1 %v1600_v1  ;;  %v3509_v1 = vld [vmem:[%s4169_s14 + $0x10] sm:$0xff]   ;;  %v3511_v2 = vld [vmem:[%s4169_s14 + $0x8] sm:$0xff]  }
 0x29d   : > { %3312 = vmatprep.mubr.msk.bf16.mxu1 %vm3526_vm0, %v3525_v0  ;;  %3297 = vmatpush3.bf16.msra.mxu1 %v3476_v7 }
 0x29e   : > { %3298 = vmatprep.subr.bf16.mxu1 %v3525_v0 }
 0x2a1   : > { %3299 = vmatpush3.bf16.msra.mxu1 %v3477_v8  ;;  %v2907_v8 = vld [vmem:[%s4167_s12] ss:$0 sm:$0xff] }
 0x2a2   : > { %3300 = vmatprep.subr.bf16.mxu1 %v3525_v0 }
 0x2a5   : > { %3301 = vmatpush3.bf16.msra.mxu1 %v3479_v9 }
 0x2a6   : > { %3302 = vmatprep.subr.bf16.mxu1 %v3525_v0 }
 0x2a9   : > { %3303 = vmatpush3.bf16.msra.mxu1 %v3481_v10  ;;  %v2908_v10 = vld [vmem:[%s4168_s13] ss:$0 sm:$0xff] }
 0x2aa   : > { %3304 = vmatprep.subr.bf16.mxu1 %v3525_v0 }
 0x2ad   : > { %3305 = vmatpush3.bf16.msra.mxu1 %v3483_v11 }
 0x2ae   : > { %3306 = vmatprep.subr.bf16.mxu1 %v3525_v0 }
 0x2b1   : > { %3307 = vmatpush3.bf16.msra.mxu1 %v3485_v12 }
 0x2b2   : > { %3308 = vmatprep.subr.bf16.mxu1 %v3525_v0 }
 0x2b5   : > { %3309 = vmatpush3.bf16.msra.mxu1 %v3487_v13 }
 0x2b6   : > { %3310 = vmatprep.subr.bf16.mxu1 %v3525_v0 }
 0x2b9   : > { %v1489_v3 = vpop.f32.mrf.mxu1  ;;  %3311 = vmatpush3.bf16.msra.mxu1 %v3489_v46 }
 0x2ba   : > { %3336 = vmatprep.subr.mxu1 %v3525_v0 }
 0x2bb   : > { %v3224_v4 = vpop.f32.mrf.mxu1 }
 0x2bd   : > { %v1492_v5 = vpop.f32.mrf.mxu1 }
 0x2bf   : > { %v3225_v6 = vpop.f32.mrf.mxu1 }
 0x358   : > { %v1577_v14 = vpop.f32.mrf.mxu0 }
 0x359   : > { %v1578_v17 = vadd.f32 %v1577_v14, %v1489_v3 }
 0x35a   : > { %v3244_v15 = vpop.f32.mrf.mxu0 }
 0x35c   : > { %v1580_v18 = vpop.f32.mrf.mxu0  ;;  %v1683_v19 = vpop.f32.mrf.mxu1 }
 0x35d   : > { %v1689_v20 = vadd.f32 %v1683_v19, %v1578_v17  ;;  %v3516_v19 = vld [vmem:[%s4156_s1] sm:$0xff] }
 0x35e   : > { %v3245_v22 = vpop.f32.mrf.mxu0  ;;  %v3264_v23 = vpop.f32.mrf.mxu1 }
 0x35f   : > { %v3943_v24 = vadd.f32 %v1689_v20, %v1206_v56  ;;  %v3492_v20 = vld [vmem:[%s4169_s14 + $0x78] sm:$0xff]   ;;  %v3494_v22 = vld [vmem:[%s4169_s14 + $0x68] sm:$0xff]  }
 0x360   : > { %v1686_v26 = vpop.f32.mrf.mxu1  ;;  %v3496_v23 = vld [vmem:[%s4169_s14 + $0x58] sm:$0xff]  }
 0x361   : > { %v1698_v27 = vmul.f32 %v2847_v21, %v3943_v24  ;;  %v3493_v21 = vld [vmem:[%s4169_s14 + $0x70] sm:$0xff]   ;;  %v3498_v26 = vld [vmem:[%s4169_s14 + $0x48] sm:$0xff]  }
 0x362   : > { %v3265_v28 = vpop.f32.mrf.mxu1 }
 0x363   : > { %v1706_v29 = vadd.f32 %v2848_v25, %v1698_v27  ;;  %v3497_v25 = vld [vmem:[%s4169_s14 + $0x50] sm:$0xff]   ;;  %v3499_v27 = vld [vmem:[%s4169_s14 + $0x40] sm:$0xff]   ;;  %v3502_v28 = vld [vmem:[%s4169_s14 + $0xb8] sm:$0xff]  }
 0x365   : > { %v1707_v30 = vmax.f32 %v1706_v29, 0.0 }
 0x367   : > { %3267 = vmatpush3.msra.mxu0 %v1707_v30  ;;  %v1882_v40 = vpack.c.bf16 %v1707_v30, %v1707_v30 }
 0x368   : > { %3269 = vmatmul.mubr.msk.f32.vlgmr.msra.gmra.mxu0 %vm530_vm1, %v3638_v16  ;;  %3271 = vmatprep.subr.mxu0 %v3525_v0  ;;  %v3469_v16 = vld [vmem:[%s4166_s11 + $0x70] sm:$0xff]  }
 0x369   : > { %3272 = vmatpush3.msra.mxu0 %v1707_v30  ;;  %3273 = vmatprep.mubr.msk.f32.mxu0 %vm3526_vm0, %v3525_v0  ;;  %v3504_v30 = vld [vmem:[%s4169_s14 + $0xb0] sm:$0xff]  }
 0x36a   : > { %3276 = vmatprep.subr.bf16.mxu0 %v3525_v0 }
 0x36c   : > { %3274 = vmatmul.mubr.msk.f32.vlgmr.msra.gmra.mxu0 %vm530_vm1, %v3831_v37 }
 0x36d   : > { %3277 = vmatpush3.bf16.msra.mxu0 %v3468_v31  ;;  %3292 = vmatprep.mubr.msk.bf16.mxu0 %vm3526_vm0, %v3525_v0  ;;  %v3506_v31 = vld [vmem:[%s4169_s14 + $0xa8] sm:$0xff]  }
 0x36e   : > { %3278 = vmatprep.subr.bf16.mxu0 %v3525_v0 }
 0x371   : > { %3279 = vmatpush3.bf16.msra.mxu0 %v3469_v16  ;;  %v3508_v16 = vld [vmem:[%s4169_s14 + $0xa0] sm:$0xff]  }
 0x372   : > { %3280 = vmatprep.subr.bf16.mxu0 %v3525_v0 }
 0x375   : > { %3281 = vmatpush3.bf16.msra.mxu0 %v3470_v32  ;;  %v3510_v32 = vld [vmem:[%s4169_s14 + $0x98] sm:$0xff]  }
 0x376   : > { %3282 = vmatprep.subr.bf16.mxu0 %v3525_v0 }
 0x379   : > { %3283 = vmatpush3.bf16.msra.mxu0 %v3471_v33  ;;  %v3512_v33 = vld [vmem:[%s4169_s14 + $0x90] sm:$0xff]  }
 0x37a   : > { %3284 = vmatprep.subr.bf16.mxu0 %v3525_v0 }
 0x37d   : > { %3285 = vmatpush3.bf16.msra.mxu0 %v3472_v34  ;;  %v3513_v34 = vld [vmem:[%s4169_s14] sm:$0xff]  }
 0x37e   : > { %3286 = vmatprep.subr.bf16.mxu0 %v3525_v0 }
 0x381   : > { %3287 = vmatpush3.bf16.msra.mxu0 %v3473_v35  ;;  %v3514_v35 = vld [vmem:[%s4169_s14 + $0x88] sm:$0xff]  }
 0x382   : > { %3288 = vmatprep.subr.bf16.mxu0 %v3525_v0 }
 0x385   : > { %3289 = vmatpush3.bf16.msra.mxu0 %v3474_v36  ;;  %v3515_v36 = vld [vmem:[%s4169_s14 + $0x80] sm:$0xff]  }
 0x386   : > { %3290 = vmatprep.subr.bf16.mxu0 %v3525_v0 }
 0x389   : > { %3291 = vmatpush3.bf16.msra.mxu0 %v3475_v38 }
 0x38a   : > { %3316 = vmatprep.subr.bf16.mxu0 %v3525_v0 }
 0x38c   : > { %3293 = vmatmul.mubr.bf16.vlgmr.msra.gmra.mxu0 %v1882_v40 }
 0x38d   : > { %3317 = vmatpush3.bf16.msra.mxu0 %v3478_v39  ;;  %3332 = vmatprep.mubr.msk.bf16.mxu0 %vm3526_vm0, %v3525_v0 }
 0x38e   : > { %3318 = vmatprep.subr.bf16.mxu0 %v3525_v0 }
 0x391   : > { %3319 = vmatpush3.bf16.msra.mxu0 %v3480_v41 }
 0x392   : > { %3320 = vmatprep.subr.bf16.mxu0 %v3525_v0 }
 0x395   : > { %3321 = vmatpush3.bf16.msra.mxu0 %v3482_v42 }
 0x396   : > { %3322 = vmatprep.subr.bf16.mxu0 %v3525_v0 }
 0x399   : > { %3323 = vmatpush3.bf16.msra.mxu0 %v3484_v43 }
 0x39a   : > { %3324 = vmatprep.subr.bf16.mxu0 %v3525_v0 }
 0x39d   : > { %3325 = vmatpush3.bf16.msra.mxu0 %v3486_v44 }
 0x39e   : > { %3326 = vmatprep.subr.bf16.mxu0 %v3525_v0 }
 0x3a1   : > { %3327 = vmatpush3.bf16.msra.mxu0 %v3488_v45 }
 0x3a2   : > { %3328 = vmatprep.subr.bf16.mxu0 %v3525_v0 }
 0x3a5   : > { %3329 = vmatpush3.bf16.msra.mxu0 %v3490_v47 }
 0x3a6   : > { %3330 = vmatprep.subr.bf16.mxu0 %v3525_v0 }
 0x3a9   : > { %3331 = vmatpush3.bf16.msra.mxu0 %v3491_v48 }
 0x3aa   : > { %3366 = vmatprep.subr.bf16.mxu0 %v3525_v0 }
 0x428   : > { %v1774_v49 = vpop.f32.mrf.mxu0 }
 0x429   : > { %v1864_v50 = vpack.c.bf16 %v1774_v49, %v1774_v49 }
 0x42a   : > { %v3270_v51 = vpop.f32.mrf.mxu0 }
 0x42b   : > { %3313 = vmatmul.mubr.bf16.vlgmr.msra.gmra.mxu1 %v1864_v50 }
 0x42c   : > { %v1844_v52 = vpop.f32.mrf.mxu0  ;;  %3338 = vmatprep.mubr.msk.f32.mxu1 %vm3526_vm0, %v3525_v0 }
 0x42d   : > { %v2076_v53 = vpack.c.bf16 %v1844_v52, %v1844_v52 }
 0x42e   : > { %v3275_v54 = vpop.f32.mrf.mxu0 }
 0x42f   : > { %3333 = vmatmul.mubr.bf16.vlgmr.msra.gmra.mxu0 %v2076_v53 }
 0x430   : > { %3382 = vmatprep.mubr.msk.bf16.mxu0 %vm3526_vm0, %v3525_v0  ;;  %3367 = vmatpush3.bf16.msra.mxu0 %v3500_v59 }
 0x431   : > { %3368 = vmatprep.subr.bf16.mxu0 %v3525_v0 }
 0x434   : > { %3369 = vmatpush3.bf16.msra.mxu0 %v3501_v60 }
 0x435   : > { %3370 = vmatprep.subr.bf16.mxu0 %v3525_v0 }
 0x438   : > { %3371 = vmatpush3.bf16.msra.mxu0 %v3503_v61 }
 0x439   : > { %3372 = vmatprep.subr.bf16.mxu0 %v3525_v0 }
 0x43c   : > { %3373 = vmatpush3.bf16.msra.mxu0 %v3505_v62 }
 0x43d   : > { %3374 = vmatprep.subr.bf16.mxu0 %v3525_v0 }
 0x440   : > { %3375 = vmatpush3.bf16.msra.mxu0 %v3507_v63 }
 0x441   : > { %3376 = vmatprep.subr.bf16.mxu0 %v3525_v0 }
 0x444   : > { %3377 = vmatpush3.bf16.msra.mxu0 %v3509_v1 }
 0x445   : > { %3378 = vmatprep.subr.bf16.mxu0 %v3525_v0 }
 0x448   : > { %3379 = vmatpush3.bf16.msra.mxu0 %v3511_v2 }
 0x449   : > { %3380 = vmatprep.subr.bf16.mxu0 %v3525_v0 }
 0x44c   : > { %v1965_v55 = vpop.f32.mrf.mxu0  ;;  %3381 = vmatpush3.bf16.msra.mxu0 %v3513_v34 }
 0x44e   : > { %v3294_v56 = vpop.f32.mrf.mxu0 }
 0x450   : > { %v1968_v57 = vpop.f32.mrf.mxu0 }
 0x452   : > { %v3295_v58 = vpop.f32.mrf.mxu0 }
 0x4eb   : > { %v2053_v3 = vpop.f32.mrf.mxu1 }
 0x4ec   : > { %v2054_v5 = vadd.f32 %v2053_v3, %v1965_v55 }
 0x4ed   : > { %v3314_v4 = vpop.f32.mrf.mxu1 }
 0x4ef   : > { %v2056_v6 = vpop.f32.mrf.mxu1  ;;  %v2159_v7 = vpop.f32.mrf.mxu0 }
 0x4f0   : > { %v2165_v9 = vadd.f32 %v2159_v7, %v2054_v5 }
 0x4f1   : > { %v3315_v11 = vpop.f32.mrf.mxu1  ;;  %v3334_v12 = vpop.f32.mrf.mxu0 }
 0x4f2   : > { %v2173_v13 = vmul.f32 %v2907_v8, %v2165_v9 }
 0x4f3   : > { %v2162_v14 = vpop.f32.mrf.mxu0 }
 0x4f4   : > { %v2181_v15 = vadd.f32 %v2908_v10, %v2173_v13 }
 0x4f5   : > { %v3335_v17 = vpop.f32.mrf.mxu0 }
 0x4f6   : > { %v2182_v18 = vmax.f32 %v2181_v15, 0.0 }
 0x4f8   : > { %3337 = vmatpush3.msra.mxu1 %v2182_v18  ;;  %v2357_v29 = vpack.c.bf16 %v2182_v18, %v2182_v18 }
 0x4f9   : > { %3339 = vmatmul.mubr.msk.f32.vlgmr.msra.gmra.mxu1 %vm530_vm1, %v3516_v19  ;;  %3341 = vmatprep.subr.mxu1 %v3525_v0 }
 0x4fa   : > { %3342 = vmatpush3.msra.mxu1 %v2182_v18  ;;  %3343 = vmatprep.mubr.msk.f32.mxu1 %vm3526_vm0, %v3525_v0 }
 0x4fb   : > { %3346 = vmatprep.subr.bf16.mxu1 %v3525_v0 }
 0x4fd   : > { %3344 = vmatmul.mubr.msk.f32.vlgmr.msra.gmra.mxu1 %vm530_vm1, %v3831_v37  ;;  %v3495_v37 = vld [vmem:[%s4169_s14 + $0x60] sm:$0xff]  }
 0x4fe   : > { %3347 = vmatpush3.bf16.msra.mxu1 %v3492_v20  ;;  %3362 = vmatprep.mubr.msk.bf16.mxu1 %vm3526_vm0, %v3525_v0 }
 0x4ff   : > { %3348 = vmatprep.subr.bf16.mxu1 %v3525_v0 }
 0x502   : > { %3349 = vmatpush3.bf16.msra.mxu1 %v3493_v21 }
 0x503   : > { %3350 = vmatprep.subr.bf16.mxu1 %v3525_v0 }
 0x506   : > { %3351 = vmatpush3.bf16.msra.mxu1 %v3494_v22 }
 0x507   : > { %3352 = vmatprep.subr.bf16.mxu1 %v3525_v0 }
 0x50a   : > { %3353 = vmatpush3.bf16.msra.mxu1 %v3495_v37 }
 0x50b   : > { %3354 = vmatprep.subr.bf16.mxu1 %v3525_v0 }
 0x50e   : > { %3355 = vmatpush3.bf16.msra.mxu1 %v3496_v23 }
 0x50f   : > { %3356 = vmatprep.subr.bf16.mxu1 %v3525_v0 }
 0x512   : > { %3357 = vmatpush3.bf16.msra.mxu1 %v3497_v25 }
 0x513   : > { %3358 = vmatprep.subr.bf16.mxu1 %v3525_v0 }
 0x516   : > { %3359 = vmatpush3.bf16.msra.mxu1 %v3498_v26 }
 0x517   : > { %3360 = vmatprep.subr.bf16.mxu1 %v3525_v0 }
 0x51a   : > { %3361 = vmatpush3.bf16.msra.mxu1 %v3499_v27 }
 0x51b   : > { %3386 = vmatprep.subr.bf16.mxu1 %v3525_v0 }
 0x51d   : > { %3363 = vmatmul.mubr.bf16.vlgmr.msra.gmra.mxu1 %v2357_v29 }
 0x51e   : > { %3387 = vmatpush3.bf16.msra.mxu1 %v3502_v28  ;;  %3402 = vmatprep.mubr.msk.bf16.mxu1 %vm3526_vm0, %v3525_v0 }
 0x51f   : > { %3388 = vmatprep.subr.bf16.mxu1 %v3525_v0 }
 0x522   : > { %3389 = vmatpush3.bf16.msra.mxu1 %v3504_v30 }
 0x523   : > { %3390 = vmatprep.subr.bf16.mxu1 %v3525_v0 }
 0x526   : > { %3391 = vmatpush3.bf16.msra.mxu1 %v3506_v31 }
 0x527   : > { %3392 = vmatprep.subr.bf16.mxu1 %v3525_v0 }
 0x52a   : > { %3393 = vmatpush3.bf16.msra.mxu1 %v3508_v16 }
 0x52b   : > { %3394 = vmatprep.subr.bf16.mxu1 %v3525_v0 }
 0x52e   : > { %3395 = vmatpush3.bf16.msra.mxu1 %v3510_v32 }
 0x52f   : > { %3396 = vmatprep.subr.bf16.mxu1 %v3525_v0 }
 0x532   : > { %3397 = vmatpush3.bf16.msra.mxu1 %v3512_v33 }
 0x533   : > { %3398 = vmatprep.subr.bf16.mxu1 %v3525_v0 }
 0x536   : > { %3399 = vmatpush3.bf16.msra.mxu1 %v3514_v35 }
 0x537   : > { %3400 = vmatprep.subr.bf16.mxu1 %v3525_v0 }
 0x53a   : > { %3401 = vmatpush3.bf16.msra.mxu1 %v3515_v36 }
 0x5b9   : > { %v2249_v38 = vpop.f32.mrf.mxu1 }
 0x5ba   : > { %v2339_v39 = vpack.c.bf16 %v2249_v38, %v2249_v38 }
 0x5bb   : > { %v3340_v40 = vpop.f32.mrf.mxu1 }
 0x5bc   : > { %3383 = vmatmul.mubr.bf16.vlgmr.msra.gmra.mxu0 %v2339_v39 }
 0x5bd   : > { %v2319_v41 = vpop.f32.mrf.mxu1 }
 0x5be   : > { %v2551_v42 = vpack.c.bf16 %v2319_v41, %v2319_v41 }
 0x5bf   : > { %v3345_v43 = vpop.f32.mrf.mxu1 }
 0x5c0   : > { %3403 = vmatmul.mubr.bf16.vlgmr.msra.gmra.mxu1 %v2551_v42 }
 0x5dd   : > { %v2440_v44 = vpop.f32.mrf.mxu1 }
 0x5df   : > { %v3364_v45 = vpop.f32.mrf.mxu1 }
 0x5e1   : > { %v2443_v46 = vpop.f32.mrf.mxu1 }
 0x5e3   : > { %v3365_v47 = vpop.f32.mrf.mxu1 }
 0x67c   : > { %v2528_v48 = vpop.f32.mrf.mxu0 }
 0x67d   : > { %v2529_v49 = vadd.f32 %v2528_v48, %v2440_v44 }
 0x67e   : > { %v3384_v0 = vpop.f32.mrf.mxu0 }
 0x680   : > { %v2634_v50 = vpop.f32.mrf.mxu1  ;;  %v2531_v51 = vpop.f32.mrf.mxu0 }
 0x681   : > { %v2640_v52 = vadd.f32 %v2634_v50, %v2529_v49 }
 0x682   : > { %v3385_v53 = vpop.f32.mrf.mxu0  ;;  %v3404_v54 = vpop.f32.mrf.mxu1 }
 0x683   : > { %v2641_v55 = vadd.f32 %v2640_v52, %v3943_v24 }
 0x684   : > { %v2637_v56 = vpop.f32.mrf.mxu1 }
 0x685   : > { %2642 = vst [vmem:[%s492_s28] sm:$0xff] %v2641_v55 }
 0x686   : > { %v3405_v57 = vpop.f32.mrf.mxu1 }
 0x687 PF: > { %s25_s18 = sadd.s32 1, %s3523_s18  }
 0x688   : > { %p22_p4 = scmp.ge.s32.totalorder %s25_s18, 4  }
 0x68a   :  { %24 = sbr.rel (!%p22_p4) target bundleno = 1 (0x1), region = 125 }

</bundles_post_ra>
